<compile_context>
chip_gen: v6e
topology: v6e:2x2x1
jax: 0.10.0
libtpu: 0.0.40
codegen_flags: <defaults>
</compile_context>

<pallas_src>
import functools
import math

import jax
import jax.numpy as jnp
from jax import lax
from jax.experimental import pallas as pl
from jax.experimental.pallas import tpu as pltpu

_MAX_TQ = 256                      # query rows per flash grid step
_MAX_TS = 1024                     # kv rows per flash grid step
_PROJ_VMEM_BUDGET = 28 * 1024 * 1024
_NEG_INF = -1e30


def _round_up(n, m):
    return ((n + m - 1) // m) * m


def _vmem_limit(need_bytes):
    limit = int(need_bytes * 1.25) + (2 << 20)
    return max(16 << 20, min(limit, 96 << 20))


def _seq_tiles(length, max_tile):
    """Pick (tile, padded_length) with tile | padded_length and tile % 8 == 0."""
    if length <= max_tile:
        tile = _round_up(length, 8)
        return tile, tile
    padded = _round_up(length, 128)
    tile = 128
    for cand in range(128, max_tile + 1, 128):
        if padded % cand == 0:
            tile = cand
    return tile, padded


def _row_tile(rows):
    for t in (512, 256, 128, 64, 32, 16, 8):
        if rows >= t and rows % t == 0:
            return t
    return rows


def _choose_proj_tiles(rows, din, dout, act_bytes, w_bytes, n_weights, n_outs):
    """Row/column tiles for a projection kernel plus its VMEM footprint."""
    tm = _row_tile(rows)
    tn = dout

    def need(tm_, tn_):
        x_blk = tm_ * din * act_bytes
        w_blk = n_weights * din * tn_ * w_bytes
        b_blk = n_outs * tn_ * 4
        o_blk = n_outs * tm_ * tn_ * act_bytes
        return 2 * (x_blk + w_blk + b_blk + o_blk)   # double-buffered

    while need(tm, tn) > _PROJ_VMEM_BUDGET and tn % 256 == 0:
        tn //= 2
    while need(tm, tn) > _PROJ_VMEM_BUDGET and tm % 16 == 0:
        tm //= 2
    return tm, tn, need(tm, tn)


# --------------------------- projection kernels ---------------------------

def _linear_kernel(x_ref, w_ref, b_ref, o_ref):
    acc = jnp.dot(x_ref[...], w_ref[...], preferred_element_type=jnp.float32)
    o_ref[...] = (acc + b_ref[...]).astype(o_ref.dtype)


def _kv_proj_kernel(x_ref, wk_ref, wv_ref, bv_ref, k_ref, v_ref):
    # Fused K/V projection: the KV-side activations are read once.
    x = x_ref[...]
    k_ref[...] = jnp.dot(
        x, wk_ref[...], preferred_element_type=jnp.float32).astype(k_ref.dtype)
    v_ref[...] = (
        jnp.dot(x, wv_ref[...], preferred_element_type=jnp.float32) + bv_ref[...]
    ).astype(v_ref.dtype)


def _linear(x2d, w_t, b_row, out_dtype):
    rows, din = x2d.shape
    dout = w_t.shape[1]
    tm, tn, need = _choose_proj_tiles(
        rows, din, dout, jnp.dtype(x2d.dtype).itemsize,
        jnp.dtype(w_t.dtype).itemsize, 1, 1)
    return pl.pallas_call(
        _linear_kernel,
        out_shape=jax.ShapeDtypeStruct((rows, dout), out_dtype),
        grid=(rows // tm, dout // tn),
        in_specs=[
            pl.BlockSpec((tm, din), lambda i, j: (i, 0)),
            pl.BlockSpec((din, tn), lambda i, j: (0, j)),
            pl.BlockSpec((1, tn), lambda i, j: (0, j)),
        ],
        out_specs=pl.BlockSpec((tm, tn), lambda i, j: (i, j)),
        compiler_params=pltpu.CompilerParams(
            dimension_semantics=("parallel", "parallel"),
            vmem_limit_bytes=_vmem_limit(need)),
    )(x2d, w_t, b_row)


def _kv_proj(x2d, wk_t, wv_t, bv_row, out_dtype):
    rows, din = x2d.shape
    dout = wk_t.shape[1]
    tm, tn, need = _choose_proj_tiles(
        rows, din, dout, jnp.dtype(x2d.dtype).itemsize,
        jnp.dtype(wk_t.dtype).itemsize, 2, 2)
    return pl.pallas_call(
        _kv_proj_kernel,
        out_shape=(jax.ShapeDtypeStruct((rows, dout), out_dtype),
                   jax.ShapeDtypeStruct((rows, dout), out_dtype)),
        grid=(rows // tm, dout // tn),
        in_specs=[
            pl.BlockSpec((tm, din), lambda i, j: (i, 0)),
            pl.BlockSpec((din, tn), lambda i, j: (0, j)),
            pl.BlockSpec((din, tn), lambda i, j: (0, j)),
            pl.BlockSpec((1, tn), lambda i, j: (0, j)),
        ],
        out_specs=(pl.BlockSpec((tm, tn), lambda i, j: (i, j)),
                   pl.BlockSpec((tm, tn), lambda i, j: (i, j))),
        compiler_params=pltpu.CompilerParams(
            dimension_semantics=("parallel", "parallel"),
            vmem_limit_bytes=_vmem_limit(need)),
    )(x2d, wk_t, wv_t, bv_row)


# --------------------------- flash attention ---------------------------

def _flash_kernel(q_ref, k_ref, v_ref, o_ref, m_sc, l_sc, acc_sc, *,
                  n_head, head_dim, valid_kv, ts, mask_kv, approx_recip):
    ki = pl.program_id(2)

    @pl.when(ki == 0)
    def _():
        m_sc[...] = jnp.full_like(m_sc, _NEG_INF)
        l_sc[...] = jnp.zeros_like(l_sc)
        acc_sc[...] = jnp.zeros_like(acc_sc)

    if mask_kv:
        col = ki * ts + lax.broadcasted_iota(jnp.int32, (1, ts), 1)
        key_valid = col < valid_kv                                  # (1, ts)

    # Heads live as static lane slices of the (tq/ts, D) blocks: no head-split
    # transposes anywhere, and the accumulator / output stay lane-dense (tq, D).
    for h in range(n_head):
        lo = h * head_dim
        hi = lo + head_dim
        q_h = q_ref[0, :, lo:hi]                                    # (tq, d)
        k_h = k_ref[0, :, lo:hi]                                    # (ts, d)
        v_h = v_ref[0, :, lo:hi]                                    # (ts, d)

        # q @ k^T — 1/sqrt(d) is already folded into the query projection.
        s = lax.dot_general(q_h, k_h, (((1,), (1,)), ((), ())),
                            preferred_element_type=jnp.float32)     # (tq, ts)
        if mask_kv:
            s = jnp.where(key_valid, s, _NEG_INF)

        m_prev = m_sc[:, h:h + 1]
        m_new = jnp.maximum(m_prev, jnp.max(s, axis=-1, keepdims=True))
        alpha = jnp.exp(m_prev - m_new)
        p = jnp.exp(s - m_new)
        l_sc[:, h:h + 1] = alpha * l_sc[:, h:h + 1] + jnp.sum(
            p, axis=-1, keepdims=True)
        acc_sc[:, lo:hi] = alpha * acc_sc[:, lo:hi] + jnp.dot(
            p.astype(v_h.dtype), v_h, preferred_element_type=jnp.float32)
        m_sc[:, h:h + 1] = m_new

    @pl.when(ki == pl.num_programs(2) - 1)
    def _():
        for h in range(n_head):
            lo = h * head_dim
            hi = lo + head_dim
            l_h = l_sc[:, h:h + 1]
            inv = pl.reciprocal(l_h, approx=True) if approx_recip else 1.0 / l_h
            acc_sc[:, lo:hi] = acc_sc[:, lo:hi] * inv
        o_ref[0] = acc_sc[...].astype(o_ref.dtype)   # lane-dense (tq, D) store


def _flash_attention(q, k, v, *, n_head, head_dim, valid_kv, tq, ts):
    """q: (B, T_pad, D), k/v: (B, S_pad, D) -> (B, T_pad, D)."""
    B, T_pad, D = q.shape
    S_pad = k.shape[1]
    cdt = q.dtype
    mask_kv = valid_kv < S_pad
    approx_recip = jnp.dtype(cdt) != jnp.dtype(jnp.float32)

    kernel = functools.partial(
        _flash_kernel, n_head=n_head, head_dim=head_dim, valid_kv=valid_kv,
        ts=ts, mask_kv=mask_kv, approx_recip=approx_recip)

    act = jnp.dtype(cdt).itemsize
    need = (2 * (2 * tq * D + 2 * ts * D) * act            # double-buffered blocks
            + (2 * tq * max(n_head, 128) + tq * D) * 4     # scratch (lane-padded)
            + 4 * tq * ts * 4)                             # s / p temporaries

    return pl.pallas_call(
        kernel,
        out_shape=jax.ShapeDtypeStruct((B, T_pad, D), cdt),
        grid=(B, T_pad // tq, S_pad // ts),
        in_specs=[
            pl.BlockSpec((1, tq, D), lambda b, qi, ki: (b, qi, 0)),
            pl.BlockSpec((1, ts, D), lambda b, qi, ki: (b, ki, 0)),
            pl.BlockSpec((1, ts, D), lambda b, qi, ki: (b, ki, 0)),
        ],
        out_specs=pl.BlockSpec((1, tq, D), lambda b, qi, ki: (b, qi, 0)),
        scratch_shapes=[
            pltpu.VMEM((tq, n_head), jnp.float32),   # running max per head
            pltpu.VMEM((tq, n_head), jnp.float32),   # running sum per head
            pltpu.VMEM((tq, D), jnp.float32),        # lane-dense output accumulator
        ],
        compiler_params=pltpu.CompilerParams(
            dimension_semantics=("parallel", "parallel", "arbitrary"),
            vmem_limit_bytes=_vmem_limit(need)),
    )(q, k, v)


# --------------------------- public wrapper ---------------------------

def prepare_mha_params(params, n_head, compute_dtype=jnp.bfloat16):
    """Hoisted per-model preprocessing (do once, not per forward call):
    transpose weights to (in, out), fold 1/sqrt(head_dim) into the query
    projection, cast matmul operands to the MXU compute dtype (biases stay f32)."""
    D = params["wq"].shape[0]
    assert D % n_head == 0
    scale = 1.0 / math.sqrt(D // n_head)
    cdt = compute_dtype
    return {
        "wq_t": (params["wq"].T * scale).astype(cdt),
        "bq": (params["bq"] * scale).reshape(1, D).astype(jnp.float32),
        "wk_t": params["wk"].T.astype(cdt),
        "wv_t": params["wv"].T.astype(cdt),
        "bv": params["bv"].reshape(1, D).astype(jnp.float32),
        "wo_t": params["wo"].T.astype(cdt),
        "bo": params["bo"].reshape(1, D).astype(jnp.float32),
    }


def multi_head_attention(x, prepared, *, n_head, xa=None):
    """x: (B, T, D); xa: optional (B, S, D) for cross-attention. Returns (B, T, D)."""
    # TODO(synk): optional attention mask (masked_fill) is not wired through; this
    #             implements the mask=None path of the reference forward().
    B, T, D = x.shape
    xkv = x if xa is None else xa
    S = xkv.shape[1]
    H = n_head
    d = D // H
    cdt = prepared["wq_t"].dtype
    out_dtype = x.dtype

    tq, T_pad = _seq_tiles(T, _MAX_TQ)
    ts, S_pad = _seq_tiles(S, _MAX_TS)

    xq = x.astype(cdt)
    if T_pad != T:
        xq = jnp.pad(xq, ((0, 0), (0, T_pad - T), (0, 0)))
    if xa is None and S_pad == T_pad:
        xk = xq
    else:
        xk = xkv.astype(cdt)
        if S_pad != S:
            xk = jnp.pad(xk, ((0, 0), (0, S_pad - S), (0, 0)))

    q = _linear(xq.reshape(B * T_pad, D), prepared["wq_t"], prepared["bq"], cdt)
    k, v = _kv_proj(xk.reshape(B * S_pad, D), prepared["wk_t"],
                    prepared["wv_t"], prepared["bv"], cdt)

    ctx = _flash_attention(
        q.reshape(B, T_pad, D), k.reshape(B, S_pad, D), v.reshape(B, S_pad, D),
        n_head=H, head_dim=d, valid_kv=S, tq=tq, ts=ts)

    out = _linear(ctx.reshape(B * T_pad, D), prepared["wo_t"], prepared["bo"],
                  out_dtype)
    out = out.reshape(B, T_pad, D)
    if T_pad != T:
        out = out[:, :T, :]
    return out


# --------------------------- reference & test ---------------------------

def _reference(x, params, n_head, xa=None):
    """Pure-JAX replica of the PyTorch forward (mask=None), full f32 precision."""
    B, T, D = x.shape
    xkv = x if xa is None else xa
    d = D // n_head
    hp = jax.lax.Precision.HIGHEST

    q = jnp.dot(x, params["wq"].T, precision=hp) + params["bq"]
    k = jnp.dot(xkv, params["wk"].T, precision=hp)
    v = jnp.dot(xkv, params["wv"].T, precision=hp) + params["bv"]

    def split(t):
        return t.reshape(t.shape[0], t.shape[1], n_head, d).transpose(0, 2, 1, 3)

    q, k, v = split(q), split(k), split(v)
    s = jnp.einsum("bhtd,bhsd->bhts", q, k, precision=hp) * (1.0 / math.sqrt(d))
    a = jax.nn.softmax(s, axis=-1)
    o = jnp.einsum("bhts,bhsd->bhtd", a, v, precision=hp)
    o = o.transpose(0, 2, 1, 3).reshape(B, T, D)
    return jnp.dot(o, params["wo"].T, precision=hp) + params["bo"]


if __name__ == "__main__":
    # Small shapes consistent with the module: batch=2, seq=8, n_state=32, n_head=4.
    B, T, D, n_head = 2, 8, 32, 4
    S_cross = 12   # cross-attention source length (exercises key padding + mask)

    key = jax.random.PRNGKey(0)
    ks = jax.random.split(key, 9)
    s = 1.0 / math.sqrt(D)
    params = {
        "wq": jax.random.uniform(ks[0], (D, D), jnp.float32, -s, s),
        "bq": jax.random.uniform(ks[1], (D,), jnp.float32, -s, s),
        "wk": jax.random.uniform(ks[2], (D, D), jnp.float32, -s, s),
        "wv": jax.random.uniform(ks[3], (D, D), jnp.float32, -s, s),
        "bv": jax.random.uniform(ks[4], (D,), jnp.float32, -s, s),
        "wo": jax.random.uniform(ks[5], (D, D), jnp.float32, -s, s),
        "bo": jax.random.uniform(ks[6], (D,), jnp.float32, -s, s),
    }
    x = jax.random.normal(ks[7], (B, T, D), jnp.float32)
    xa = jax.random.normal(ks[8], (B, S_cross, D), jnp.float32)

    fwd = jax.jit(multi_head_attention, static_argnames=("n_head",))

    # 1) Strict-parity path: f32 MXU operands + exact reciprocal.
    prep_f32 = prepare_mha_params(params, n_head, compute_dtype=jnp.float32)
    out_f32 = jax.block_until_ready(fwd(x, prep_f32, n_head=n_head))
    ref_self = _reference(x, params, n_head)
    assert out_f32.shape == (B, T, D)
    err = jnp.max(jnp.abs(out_f32 - ref_self))
    assert jnp.allclose(out_f32, ref_self, rtol=2e-3, atol=2e-3), \
        f"f32 self-attn max abs err {err}"

    # 2) Performance path: bf16 MXU operands, f32 accumulation (default).
    prep_bf16 = prepare_mha_params(params, n_head, compute_dtype=jnp.bfloat16)
    out_bf16 = jax.block_until_ready(fwd(x, prep_bf16, n_head=n_head))
    err = jnp.max(jnp.abs(out_bf16 - ref_self))
    assert jnp.allclose(out_bf16, ref_self, rtol=5e-2, atol=5e-2), \
        f"bf16 self-attn max abs err {err}"

    # 3) Cross-attention with a padded/masked key length.
    out_x = jax.block_until_ready(fwd(x, prep_bf16, n_head=n_head, xa=xa))
    ref_x = _reference(x, params, n_head, xa=xa)
    assert out_x.shape == (B, T, D)
    err = jnp.max(jnp.abs(out_x - ref_x))
    assert jnp.allclose(out_x, ref_x, rtol=5e-2, atol=5e-2), \
        f"bf16 cross-attn max abs err {err}"

    print("KERNEL_OK")
</pallas_src>

<mosaic_0001>
module attributes {stable_mosaic.version = 11 : i64} {
  func.func @_linear_kernel(%arg0: i32, %arg1: i32, %arg2: memref<16x32xf32, #tpu.memory_space<vmem>>, %arg3: memref<32x32xf32, #tpu.memory_space<vmem>>, %arg4: memref<1x32xf32, #tpu.memory_space<vmem>>, %arg5: memref<16x32xf32, #tpu.memory_space<vmem>>) attributes {dimension_semantics = [#tpu.dimension_semantics<parallel>, #tpu.dimension_semantics<parallel>], iteration_bounds = array<i64: 1, 1>, scalar_prefetch = 0 : i64, scratch_operands = 0 : i64, tpu.core_type = #tpu.core_type<tc>, window_params = [{transform_indices = @transform_0, window_bounds = array<i64: 16, 32>}, {transform_indices = @transform_1, window_bounds = array<i64: 32, 32>}, {transform_indices = @transform_2, window_bounds = array<i64: 1, 32>}, {transform_indices = @transform_3, window_bounds = array<i64: 16, 32>}]} {
    %c0 = arith.constant 0 : index
    %c0_0 = arith.constant 0 : index
    %0 = vector.load %arg2[%c0, %c0_0] : memref<16x32xf32, #tpu.memory_space<vmem>>, vector<16x32xf32>
    %c0_1 = arith.constant 0 : index
    %c0_2 = arith.constant 0 : index
    %1 = vector.load %arg3[%c0_1, %c0_2] : memref<32x32xf32, #tpu.memory_space<vmem>>, vector<32x32xf32>
    %cst = arith.constant dense<0.000000e+00> : vector<16x32xf32>
    %2 = tpu.matmul %0, %1, %cst {dimension_numbers = #tpu.dot_dimension_numbers<[1], [0], [0], [1], [0, 0, 1, 1], [], []>} : vector<16x32xf32>, vector<32x32xf32>, vector<16x32xf32> -> vector<16x32xf32>
    %c0_3 = arith.constant 0 : index
    %c0_4 = arith.constant 0 : index
    %3 = vector.load %arg4[%c0_3, %c0_4] : memref<1x32xf32, #tpu.memory_space<vmem>>, vector<1x32xf32>
    %4 = vector.broadcast %3 : vector<1x32xf32> to vector<16x32xf32>
    %5 = arith.addf %2, %4 : vector<16x32xf32>
    %c0_5 = arith.constant 0 : index
    %c0_6 = arith.constant 0 : index
    %6 = vector.load %arg5[%c0_5, %c0_6] : memref<16x32xf32, #tpu.memory_space<vmem>>, vector<16x32xf32>
    tpu.vector_store %arg5[%c0_5, %c0_6], %5 {strides = array<i32>} : memref<16x32xf32, #tpu.memory_space<vmem>>, vector<16x32xf32>,
    return
  }
  func.func @transform_0(%arg0: i32, %arg1: i32) -> (i32, i32) {
    %c0_i32 = arith.constant 0 : i32
    %c0_i32_0 = arith.constant 0 : i32
    return %arg0, %c0_i32 : i32, i32
  }
  func.func @transform_1(%arg0: i32, %arg1: i32) -> (i32, i32) {
    %c0_i32 = arith.constant 0 : i32
    %c0_i32_0 = arith.constant 0 : i32
    return %c0_i32, %arg1 : i32, i32
  }
  func.func @transform_2(%arg0: i32, %arg1: i32) -> (i32, i32) {
    %c0_i32 = arith.constant 0 : i32
    %c0_i32_0 = arith.constant 0 : i32
    return %c0_i32, %arg1 : i32, i32
  }
  func.func @transform_3(%arg0: i32, %arg1: i32) -> (i32, i32) {
    %c0_i32 = arith.constant 0 : i32
    return %arg0, %arg1 : i32, i32
  }
}

module attributes {stable_mosaic.version = 11 : i64} {
  func.func @_linear_kernel(%arg0: i32, %arg1: i32, %arg2: memref<16x32xf32, #tpu.memory_space<vmem>>, %arg3: memref<32x32xf32, #tpu.memory_space<vmem>>, %arg4: memref<1x32xf32, #tpu.memory_space<vmem>>, %arg5: memref<16x32xf32, #tpu.memory_space<vmem>>) attributes {dimension_semantics = [#tpu.dimension_semantics<parallel>, #tpu.dimension_semantics<parallel>], iteration_bounds = array<i64: 1, 1>, scalar_prefetch = 0 : i64, scratch_operands = 0 : i64, tpu.core_type = #tpu.core_type<tc>, window_params = [{transform_indices = @transform_0, window_bounds = array<i64: 16, 32>}, {transform_indices = @transform_1, window_bounds = array<i64: 32, 32>}, {transform_indices = @transform_2, window_bounds = array<i64: 1, 32>}, {transform_indices = @transform_3, window_bounds = array<i64: 16, 32>}]} {
    %c0 = arith.constant 0 : index
    %c0_0 = arith.constant 0 : index
    %0 = vector.load %arg2[%c0, %c0_0] : memref<16x32xf32, #tpu.memory_space<vmem>>, vector<16x32xf32>
    %c0_1 = arith.constant 0 : index
    %c0_2 = arith.constant 0 : index
    %1 = vector.load %arg3[%c0_1, %c0_2] : memref<32x32xf32, #tpu.memory_space<vmem>>, vector<32x32xf32>
    %cst = arith.constant dense<0.000000e+00> : vector<16x32xf32>
    %2 = tpu.matmul %0, %1, %cst {dimension_numbers = #tpu.dot_dimension_numbers<[1], [0], [0], [1], [0, 0, 1, 1], [], []>} : vector<16x32xf32>, vector<32x32xf32>, vector<16x32xf32> -> vector<16x32xf32>
    %c0_3 = arith.constant 0 : index
    %c0_4 = arith.constant 0 : index
    %3 = vector.load %arg4[%c0_3, %c0_4] : memref<1x32xf32, #tpu.memory_space<vmem>>, vector<1x32xf32>
    %4 = vector.broadcast %3 : vector<1x32xf32> to vector<16x32xf32>
    %5 = arith.addf %2, %4 : vector<16x32xf32>
    %c0_5 = arith.constant 0 : index
    %c0_6 = arith.constant 0 : index
    %6 = vector.load %arg5[%c0_5, %c0_6] : memref<16x32xf32, #tpu.memory_space<vmem>>, vector<16x32xf32>
    tpu.vector_store %arg5[%c0_5, %c0_6], %5 {strides = array<i32>} : memref<16x32xf32, #tpu.memory_space<vmem>>, vector<16x32xf32>,
    return
  }
  func.func @transform_0(%arg0: i32, %arg1: i32) -> (i32, i32) {
    %c0_i32 = arith.constant 0 : i32
    %c0_i32_0 = arith.constant 0 : i32
    return %arg0, %c0_i32 : i32, i32
  }
  func.func @transform_1(%arg0: i32, %arg1: i32) -> (i32, i32) {
    %c0_i32 = arith.constant 0 : i32
    %c0_i32_0 = arith.constant 0 : i32
    return %c0_i32, %arg1 : i32, i32
  }
  func.func @transform_2(%arg0: i32, %arg1: i32) -> (i32, i32) {
    %c0_i32 = arith.constant 0 : i32
    %c0_i32_0 = arith.constant 0 : i32
    return %c0_i32, %arg1 : i32, i32
  }
  func.func @transform_3(%arg0: i32, %arg1: i32) -> (i32, i32) {
    %c0_i32 = arith.constant 0 : i32
    return %arg0, %arg1 : i32, i32
  }
}

module attributes {stable_mosaic.version = 11 : i64} {
  func.func @_kv_proj_kernel(%arg0: i32, %arg1: i32, %arg2: memref<16x32xf32, #tpu.memory_space<vmem>>, %arg3: memref<32x32xf32, #tpu.memory_space<vmem>>, %arg4: memref<32x32xf32, #tpu.memory_space<vmem>>, %arg5: memref<1x32xf32, #tpu.memory_space<vmem>>, %arg6: memref<16x32xf32, #tpu.memory_space<vmem>>, %arg7: memref<16x32xf32, #tpu.memory_space<vmem>>) attributes {dimension_semantics = [#tpu.dimension_semantics<parallel>, #tpu.dimension_semantics<parallel>], iteration_bounds = array<i64: 1, 1>, scalar_prefetch = 0 : i64, scratch_operands = 0 : i64, tpu.core_type = #tpu.core_type<tc>, window_params = [{transform_indices = @transform_0, window_bounds = array<i64: 16, 32>}, {transform_indices = @transform_1, window_bounds = array<i64: 32, 32>}, {transform_indices = @transform_2, window_bounds = array<i64: 32, 32>}, {transform_indices = @transform_3, window_bounds = array<i64: 1, 32>}, {transform_indices = @transform_4, window_bounds = array<i64: 16, 32>}, {transform_indices = @transform_5, window_bounds = array<i64: 16, 32>}]} {
    %c0 = arith.constant 0 : index
    %c0_0 = arith.constant 0 : index
    %0 = vector.load %arg2[%c0, %c0_0] : memref<16x32xf32, #tpu.memory_space<vmem>>, vector<16x32xf32>
    %c0_1 = arith.constant 0 : index
    %c0_2 = arith.constant 0 : index
    %1 = vector.load %arg3[%c0_1, %c0_2] : memref<32x32xf32, #tpu.memory_space<vmem>>, vector<32x32xf32>
    %cst = arith.constant dense<0.000000e+00> : vector<16x32xf32>
    %2 = tpu.matmul %0, %1, %cst {dimension_numbers = #tpu.dot_dimension_numbers<[1], [0], [0], [1], [0, 0, 1, 1], [], []>} : vector<16x32xf32>, vector<32x32xf32>, vector<16x32xf32> -> vector<16x32xf32>
    %c0_3 = arith.constant 0 : index
    %c0_4 = arith.constant 0 : index
    %3 = vector.load %arg6[%c0_3, %c0_4] : memref<16x32xf32, #tpu.memory_space<vmem>>, vector<16x32xf32>
    tpu.vector_store %arg6[%c0_3, %c0_4], %2 {strides = array<i32>} : memref<16x32xf32, #tpu.memory_space<vmem>>, vector<16x32xf32>,
    %c0_5 = arith.constant 0 : index
    %c0_6 = arith.constant 0 : index
    %4 = vector.load %arg4[%c0_5, %c0_6] : memref<32x32xf32, #tpu.memory_space<vmem>>, vector<32x32xf32>
    %cst_7 = arith.constant dense<0.000000e+00> : vector<16x32xf32>
    %5 = tpu.matmul %0, %4, %cst_7 {dimension_numbers = #tpu.dot_dimension_numbers<[1], [0], [0], [1], [0, 0, 1, 1], [], []>} : vector<16x32xf32>, vector<32x32xf32>, vector<16x32xf32> -> vector<16x32xf32>
    %c0_8 = arith.constant 0 : index
    %c0_9 = arith.constant 0 : index
    %6 = vector.load %arg5[%c0_8, %c0_9] : memref<1x32xf32, #tpu.memory_space<vmem>>, vector<1x32xf32>
    %7 = vector.broadcast %6 : vector<1x32xf32> to vector<16x32xf32>
    %8 = arith.addf %5, %7 : vector<16x32xf32>
    %c0_10 = arith.constant 0 : index
    %c0_11 = arith.constant 0 : index
    %9 = vector.load %arg7[%c0_10, %c0_11] : memref<16x32xf32, #tpu.memory_space<vmem>>, vector<16x32xf32>
    tpu.vector_store %arg7[%c0_10, %c0_11], %8 {strides = array<i32>} : memref<16x32xf32, #tpu.memory_space<vmem>>, vector<16x32xf32>,
    return
  }
  func.func @transform_0(%arg0: i32, %arg1: i32) -> (i32, i32) {
    %c0_i32 = arith.constant 0 : i32
    %c0_i32_0 = arith.constant 0 : i32
    return %arg0, %c0_i32 : i32, i32
  }
  func.func @transform_1(%arg0: i32, %arg1: i32) -> (i32, i32) {
    %c0_i32 = arith.constant 0 : i32
    %c0_i32_0 = arith.constant 0 : i32
    return %c0_i32, %arg1 : i32, i32
  }
  func.func @transform_2(%arg0: i32, %arg1: i32) -> (i32, i32) {
    %c0_i32 = arith.constant 0 : i32
    %c0_i32_0 = arith.constant 0 : i32
    return %c0_i32, %arg1 : i32, i32
  }
  func.func @transform_3(%arg0: i32, %arg1: i32) -> (i32, i32) {
    %c0_i32 = arith.constant 0 : i32
    %c0_i32_0 = arith.constant 0 : i32
    return %c0_i32, %arg1 : i32, i32
  }
  func.func @transform_4(%arg0: i32, %arg1: i32) -> (i32, i32) {
    %c0_i32 = arith.constant 0 : i32
    return %arg0, %arg1 : i32, i32
  }
  func.func @transform_5(%arg0: i32, %arg1: i32) -> (i32, i32) {
    %c0_i32 = arith.constant 0 : i32
    return %arg0, %arg1 : i32, i32
  }
}

module attributes {stable_mosaic.version = 11 : i64} {
  func.func @_flash_kernel(%arg0: i32, %arg1: i32, %arg2: i32, %arg3: memref<1x8x32xf32, #tpu.memory_space<vmem>>, %arg4: memref<1x8x32xf32, #tpu.memory_space<vmem>>, %arg5: memref<1x8x32xf32, #tpu.memory_space<vmem>>, %arg6: memref<1x8x32xf32, #tpu.memory_space<vmem>>, %arg7: memref<8x4xf32, #tpu.memory_space<vmem>>, %arg8: memref<8x4xf32, #tpu.memory_space<vmem>>, %arg9: memref<8x32xf32, #tpu.memory_space<vmem>>) attributes {dimension_semantics = [#tpu.dimension_semantics<parallel>, #tpu.dimension_semantics<parallel>, #tpu.dimension_semantics<arbitrary>], iteration_bounds = array<i64: 2, 1, 1>, scalar_prefetch = 0 : i64, scratch_operands = 3 : i64, tpu.core_type = #tpu.core_type<tc>, window_params = [{transform_indices = @transform_0, window_bounds = array<i64: 1, 8, 32>}, {transform_indices = @transform_1, window_bounds = array<i64: 1, 8, 32>}, {transform_indices = @transform_2, window_bounds = array<i64: 1, 8, 32>}, {transform_indices = @transform_3, window_bounds = array<i64: 1, 8, 32>}]} {
    %c0_i32 = arith.constant 0 : i32
    %0 = arith.cmpi eq, %arg2, %c0_i32 : i32
    %1 = arith.extui %0 : i1 to i32
    %c0_i32_0 = arith.constant 0 : i32
    %2 = arith.cmpi ne, %1, %c0_i32_0 : i32
    scf.if %2 {
      %cst_95 = arith.constant -1.000000e+30 : f32
      %122 = vector.broadcast %cst_95 : f32 to vector<8x4xf32>
      %c0_96 = arith.constant 0 : index
      %c0_97 = arith.constant 0 : index
      %123 = vector.load %arg7[%c0_96, %c0_97] : memref<8x4xf32, #tpu.memory_space<vmem>>, vector<8x4xf32>
      tpu.vector_store %arg7[%c0_96, %c0_97], %122 {strides = array<i32>} : memref<8x4xf32, #tpu.memory_space<vmem>>, vector<8x4xf32>,
      %cst_98 = arith.constant 0.000000e+00 : f32
      %124 = vector.broadcast %cst_98 : f32 to vector<8x4xf32>
      %c0_99 = arith.constant 0 : index
      %c0_100 = arith.constant 0 : index
      %125 = vector.load %arg8[%c0_99, %c0_100] : memref<8x4xf32, #tpu.memory_space<vmem>>, vector<8x4xf32>
      tpu.vector_store %arg8[%c0_99, %c0_100], %124 {strides = array<i32>} : memref<8x4xf32, #tpu.memory_space<vmem>>, vector<8x4xf32>,
      %cst_101 = arith.constant 0.000000e+00 : f32
      %126 = vector.broadcast %cst_101 : f32 to vector<8x32xf32>
      %c0_102 = arith.constant 0 : index
      %c0_103 = arith.constant 0 : index
      %127 = vector.load %arg9[%c0_102, %c0_103] : memref<8x32xf32, #tpu.memory_space<vmem>>, vector<8x32xf32>
      tpu.vector_store %arg9[%c0_102, %c0_103], %126 {strides = array<i32>} : memref<8x32xf32, #tpu.memory_space<vmem>>, vector<8x32xf32>,
    } else {
    }
    %c0 = arith.constant 0 : index
    %c0_1 = arith.constant 0 : index
    %c0_2 = arith.constant 0 : index
    %3 = vector.load %arg3[%c0, %c0_1, %c0_2] : memref<1x8x32xf32, #tpu.memory_space<vmem>>, vector<1x8x8xf32>
    %4 = vector.shape_cast %3 : vector<1x8x8xf32> to vector<8x8xf32>
    %c0_3 = arith.constant 0 : index
    %c0_4 = arith.constant 0 : index
    %c0_5 = arith.constant 0 : index
    %5 = vector.load %arg4[%c0_3, %c0_4, %c0_5] : memref<1x8x32xf32, #tpu.memory_space<vmem>>, vector<1x8x8xf32>
    %6 = vector.shape_cast %5 : vector<1x8x8xf32> to vector<8x8xf32>
    %c0_6 = arith.constant 0 : index
    %c0_7 = arith.constant 0 : index
    %c0_8 = arith.constant 0 : index
    %7 = vector.load %arg5[%c0_6, %c0_7, %c0_8] : memref<1x8x32xf32, #tpu.memory_space<vmem>>, vector<1x8x8xf32>
    %8 = vector.shape_cast %7 : vector<1x8x8xf32> to vector<8x8xf32>
    %cst = arith.constant dense<0.000000e+00> : vector<8x8xf32>
    %9 = tpu.matmul %4, %6, %cst {dimension_numbers = #tpu.dot_dimension_numbers<[1], [1], [0], [0], [0, 0, 1, 0], [], []>} : vector<8x8xf32>, vector<8x8xf32>, vector<8x8xf32> -> vector<8x8xf32>
    %c0_9 = arith.constant 0 : index
    %c0_10 = arith.constant 0 : index
    %10 = vector.load %arg7[%c0_9, %c0_10] : memref<8x4xf32, #tpu.memory_space<vmem>>, vector<8x1xf32>
    %cst_11 = arith.constant dense<0xFF800000> : vector<8xf32>
    %11 = vector.multi_reduction <maximumf>, %9, %cst_11 [1] : vector<8x8xf32> to vector<8xf32>
    %12 = vector.shape_cast %11 : vector<8xf32> to vector<8x1xf32>
    %13 = arith.maximumf %10, %12 : vector<8x1xf32>
    %14 = arith.subf %10, %13 : vector<8x1xf32>
    %15 = math.exp %14 : vector<8x1xf32>
    %16 = vector.broadcast %13 : vector<8x1xf32> to vector<8x8xf32>
    %17 = arith.subf %9, %16 : vector<8x8xf32>
    %18 = math.exp %17 : vector<8x8xf32>
    %c0_12 = arith.constant 0 : index
    %c0_13 = arith.constant 0 : index
    %19 = vector.load %arg8[%c0_12, %c0_13] : memref<8x4xf32, #tpu.memory_space<vmem>>, vector<8x1xf32>
    %20 = arith.mulf %15, %19 : vector<8x1xf32>
    %cst_14 = arith.constant dense<0.000000e+00> : vector<8xf32>
    %21 = vector.multi_reduction <add>, %18, %cst_14 [1] : vector<8x8xf32> to vector<8xf32>
    %22 = vector.shape_cast %21 : vector<8xf32> to vector<8x1xf32>
    %23 = arith.addf %20, %22 : vector<8x1xf32>
    %c0_15 = arith.constant 0 : index
    %c0_16 = arith.constant 0 : index
    %24 = vector.load %arg8[%c0_15, %c0_16] : memref<8x4xf32, #tpu.memory_space<vmem>>, vector<8x1xf32>
    tpu.vector_store %arg8[%c0_15, %c0_16], %23 {strides = array<i32>} : memref<8x4xf32, #tpu.memory_space<vmem>>, vector<8x1xf32>,
    %c0_17 = arith.constant 0 : index
    %c0_18 = arith.constant 0 : index
    %25 = vector.load %arg9[%c0_17, %c0_18] : memref<8x32xf32, #tpu.memory_space<vmem>>, vector<8x8xf32>
    %26 = vector.broadcast %15 : vector<8x1xf32> to vector<8x8xf32>
    %27 = arith.mulf %26, %25 : vector<8x8xf32>
    %cst_19 = arith.constant dense<0.000000e+00> : vector<8x8xf32>
    %28 = tpu.matmul %18, %8, %cst_19 {dimension_numbers = #tpu.dot_dimension_numbers<[1], [0], [0], [1], [0, 0, 1, 1], [], []>} : vector<8x8xf32>, vector<8x8xf32>, vector<8x8xf32> -> vector<8x8xf32>
    %29 = arith.addf %27, %28 : vector<8x8xf32>
    %c0_20 = arith.constant 0 : index
    %c0_21 = arith.constant 0 : index
    %30 = vector.load %arg9[%c0_20, %c0_21] : memref<8x32xf32, #tpu.memory_space<vmem>>, vector<8x8xf32>
    tpu.vector_store %arg9[%c0_20, %c0_21], %29 {strides = array<i32>} : memref<8x32xf32, #tpu.memory_space<vmem>>, vector<8x8xf32>,
    %c0_22 = arith.constant 0 : index
    %c0_23 = arith.constant 0 : index
    %31 = vector.load %arg7[%c0_22, %c0_23] : memref<8x4xf32, #tpu.memory_space<vmem>>, vector<8x1xf32>
    tpu.vector_store %arg7[%c0_22, %c0_23], %13 {strides = array<i32>} : memref<8x4xf32, #tpu.memory_space<vmem>>, vector<8x1xf32>,
    %c0_24 = arith.constant 0 : index
    %c0_25 = arith.constant 0 : index
    %c8 = arith.constant 8 : index
    %32 = vector.load %arg3[%c0_24, %c0_25, %c8] : memref<1x8x32xf32, #tpu.memory_space<vmem>>, vector<1x8x8xf32>
    %33 = vector.shape_cast %32 : vector<1x8x8xf32> to vector<8x8xf32>
    %c0_26 = arith.constant 0 : index
    %c0_27 = arith.constant 0 : index
    %c8_28 = arith.constant 8 : index
    %34 = vector.load %arg4[%c0_26, %c0_27, %c8_28] : memref<1x8x32xf32, #tpu.memory_space<vmem>>, vector<1x8x8xf32>
    %35 = vector.shape_cast %34 : vector<1x8x8xf32> to vector<8x8xf32>
    %c0_29 = arith.constant 0 : index
    %c0_30 = arith.constant 0 : index
    %c8_31 = arith.constant 8 : index
    %36 = vector.load %arg5[%c0_29, %c0_30, %c8_31] : memref<1x8x32xf32, #tpu.memory_space<vmem>>, vector<1x8x8xf32>
    %37 = vector.shape_cast %36 : vector<1x8x8xf32> to vector<8x8xf32>
    %cst_32 = arith.constant dense<0.000000e+00> : vector<8x8xf32>
    %38 = tpu.matmul %33, %35, %cst_32 {dimension_numbers = #tpu.dot_dimension_numbers<[1], [1], [0], [0], [0, 0, 1, 0], [], []>} : vector<8x8xf32>, vector<8x8xf32>, vector<8x8xf32> -> vector<8x8xf32>
    %c0_33 = arith.constant 0 : index
    %c1 = arith.constant 1 : index
    %39 = vector.load %arg7[%c0_33, %c1] : memref<8x4xf32, #tpu.memory_space<vmem>>, vector<8x1xf32>
    %cst_34 = arith.constant dense<0xFF800000> : vector<8xf32>
    %40 = vector.multi_reduction <maximumf>, %38, %cst_34 [1] : vector<8x8xf32> to vector<8xf32>
    %41 = vector.shape_cast %40 : vector<8xf32> to vector<8x1xf32>
    %42 = arith.maximumf %39, %41 : vector<8x1xf32>
    %43 = arith.subf %39, %42 : vector<8x1xf32>
    %44 = math.exp %43 : vector<8x1xf32>
    %45 = vector.broadcast %42 : vector<8x1xf32> to vector<8x8xf32>
    %46 = arith.subf %38, %45 : vector<8x8xf32>
    %47 = math.exp %46 : vector<8x8xf32>
    %c0_35 = arith.constant 0 : index
    %c1_36 = arith.constant 1 : index
    %48 = vector.load %arg8[%c0_35, %c1_36] : memref<8x4xf32, #tpu.memory_space<vmem>>, vector<8x1xf32>
    %49 = arith.mulf %44, %48 : vector<8x1xf32>
    %cst_37 = arith.constant dense<0.000000e+00> : vector<8xf32>
    %50 = vector.multi_reduction <add>, %47, %cst_37 [1] : vector<8x8xf32> to vector<8xf32>
    %51 = vector.shape_cast %50 : vector<8xf32> to vector<8x1xf32>
    %52 = arith.addf %49, %51 : vector<8x1xf32>
    %c0_38 = arith.constant 0 : index
    %c1_39 = arith.constant 1 : index
    %53 = vector.load %arg8[%c0_38, %c1_39] : memref<8x4xf32, #tpu.memory_space<vmem>>, vector<8x1xf32>
    tpu.vector_store %arg8[%c0_38, %c1_39], %52 {strides = array<i32>} : memref<8x4xf32, #tpu.memory_space<vmem>>, vector<8x1xf32>,
    %c0_40 = arith.constant 0 : index
    %c8_41 = arith.constant 8 : index
    %54 = vector.load %arg9[%c0_40, %c8_41] : memref<8x32xf32, #tpu.memory_space<vmem>>, vector<8x8xf32>
    %55 = vector.broadcast %44 : vector<8x1xf32> to vector<8x8xf32>
    %56 = arith.mulf %55, %54 : vector<8x8xf32>
    %cst_42 = arith.constant dense<0.000000e+00> : vector<8x8xf32>
    %57 = tpu.matmul %47, %37, %cst_42 {dimension_numbers = #tpu.dot_dimension_numbers<[1], [0], [0], [1], [0, 0, 1, 1], [], []>} : vector<8x8xf32>, vector<8x8xf32>, vector<8x8xf32> -> vector<8x8xf32>
    %58 = arith.addf %56, %57 : vector<8x8xf32>
    %c0_43 = arith.constant 0 : index
    %c8_44 = arith.constant 8 : index
    %59 = vector.load %arg9[%c0_43, %c8_44] : memref<8x32xf32, #tpu.memory_space<vmem>>, vector<8x8xf32>
    tpu.vector_store %arg9[%c0_43, %c8_44], %58 {strides = array<i32>} : memref<8x32xf32, #tpu.memory_space<vmem>>, vector<8x8xf32>,
    %c0_45 = arith.constant 0 : index
    %c1_46 = arith.constant 1 : index
    %60 = vector.load %arg7[%c0_45, %c1_46] : memref<8x4xf32, #tpu.memory_space<vmem>>, vector<8x1xf32>
    tpu.vector_store %arg7[%c0_45, %c1_46], %42 {strides = array<i32>} : memref<8x4xf32, #tpu.memory_space<vmem>>, vector<8x1xf32>,
    %c0_47 = arith.constant 0 : index
    %c0_48 = arith.constant 0 : index
    %c16 = arith.constant 16 : index
    %61 = vector.load %arg3[%c0_47, %c0_48, %c16] : memref<1x8x32xf32, #tpu.memory_space<vmem>>, vector<1x8x8xf32>
    %62 = vector.shape_cast %61 : vector<1x8x8xf32> to vector<8x8xf32>
    %c0_49 = arith.constant 0 : index
    %c0_50 = arith.constant 0 : index
    %c16_51 = arith.constant 16 : index
    %63 = vector.load %arg4[%c0_49, %c0_50, %c16_51] : memref<1x8x32xf32, #tpu.memory_space<vmem>>, vector<1x8x8xf32>
    %64 = vector.shape_cast %63 : vector<1x8x8xf32> to vector<8x8xf32>
    %c0_52 = arith.constant 0 : index
    %c0_53 = arith.constant 0 : index
    %c16_54 = arith.constant 16 : index
    %65 = vector.load %arg5[%c0_52, %c0_53, %c16_54] : memref<1x8x32xf32, #tpu.memory_space<vmem>>, vector<1x8x8xf32>
    %66 = vector.shape_cast %65 : vector<1x8x8xf32> to vector<8x8xf32>
    %cst_55 = arith.constant dense<0.000000e+00> : vector<8x8xf32>
    %67 = tpu.matmul %62, %64, %cst_55 {dimension_numbers = #tpu.dot_dimension_numbers<[1], [1], [0], [0], [0, 0, 1, 0], [], []>} : vector<8x8xf32>, vector<8x8xf32>, vector<8x8xf32> -> vector<8x8xf32>
    %c0_56 = arith.constant 0 : index
    %c2 = arith.constant 2 : index
    %68 = vector.load %arg7[%c0_56, %c2] : memref<8x4xf32, #tpu.memory_space<vmem>>, vector<8x1xf32>
    %cst_57 = arith.constant dense<0xFF800000> : vector<8xf32>
    %69 = vector.multi_reduction <maximumf>, %67, %cst_57 [1] : vector<8x8xf32> to vector<8xf32>
    %70 = vector.shape_cast %69 : vector<8xf32> to vector<8x1xf32>
    %71 = arith.maximumf %68, %70 : vector<8x1xf32>
    %72 = arith.subf %68, %71 : vector<8x1xf32>
    %73 = math.exp %72 : vector<8x1xf32>
    %74 = vector.broadcast %71 : vector<8x1xf32> to vector<8x8xf32>
    %75 = arith.subf %67, %74 : vector<8x8xf32>
    %76 = math.exp %75 : vector<8x8xf32>
    %c0_58 = arith.constant 0 : index
    %c2_59 = arith.constant 2 : index
    %77 = vector.load %arg8[%c0_58, %c2_59] : memref<8x4xf32, #tpu.memory_space<vmem>>, vector<8x1xf32>
    %78 = arith.mulf %73, %77 : vector<8x1xf32>
    %cst_60 = arith.constant dense<0.000000e+00> : vector<8xf32>
    %79 = vector.multi_reduction <add>, %76, %cst_60 [1] : vector<8x8xf32> to vector<8xf32>
    %80 = vector.shape_cast %79 : vector<8xf32> to vector<8x1xf32>
    %81 = arith.addf %78, %80 : vector<8x1xf32>
    %c0_61 = arith.constant 0 : index
    %c2_62 = arith.constant 2 : index
    %82 = vector.load %arg8[%c0_61, %c2_62] : memref<8x4xf32, #tpu.memory_space<vmem>>, vector<8x1xf32>
    tpu.vector_store %arg8[%c0_61, %c2_62], %81 {strides = array<i32>} : memref<8x4xf32, #tpu.memory_space<vmem>>, vector<8x1xf32>,
    %c0_63 = arith.constant 0 : index
    %c16_64 = arith.constant 16 : index
    %83 = vector.load %arg9[%c0_63, %c16_64] : memref<8x32xf32, #tpu.memory_space<vmem>>, vector<8x8xf32>
    %84 = vector.broadcast %73 : vector<8x1xf32> to vector<8x8xf32>
    %85 = arith.mulf %84, %83 : vector<8x8xf32>
    %cst_65 = arith.constant dense<0.000000e+00> : vector<8x8xf32>
    %86 = tpu.matmul %76, %66, %cst_65 {dimension_numbers = #tpu.dot_dimension_numbers<[1], [0], [0], [1], [0, 0, 1, 1], [], []>} : vector<8x8xf32>, vector<8x8xf32>, vector<8x8xf32> -> vector<8x8xf32>
    %87 = arith.addf %85, %86 : vector<8x8xf32>
    %c0_66 = arith.constant 0 : index
    %c16_67 = arith.constant 16 : index
    %88 = vector.load %arg9[%c0_66, %c16_67] : memref<8x32xf32, #tpu.memory_space<vmem>>, vector<8x8xf32>
    tpu.vector_store %arg9[%c0_66, %c16_67], %87 {strides = array<i32>} : memref<8x32xf32, #tpu.memory_space<vmem>>, vector<8x8xf32>,
    %c0_68 = arith.constant 0 : index
    %c2_69 = arith.constant 2 : index
    %89 = vector.load %arg7[%c0_68, %c2_69] : memref<8x4xf32, #tpu.memory_space<vmem>>, vector<8x1xf32>
    tpu.vector_store %arg7[%c0_68, %c2_69], %71 {strides = array<i32>} : memref<8x4xf32, #tpu.memory_space<vmem>>, vector<8x1xf32>,
    %c0_70 = arith.constant 0 : index
    %c0_71 = arith.constant 0 : index
    %c24 = arith.constant 24 : index
    %90 = vector.load %arg3[%c0_70, %c0_71, %c24] : memref<1x8x32xf32, #tpu.memory_space<vmem>>, vector<1x8x8xf32>
    %91 = vector.shape_cast %90 : vector<1x8x8xf32> to vector<8x8xf32>
    %c0_72 = arith.constant 0 : index
    %c0_73 = arith.constant 0 : index
    %c24_74 = arith.constant 24 : index
    %92 = vector.load %arg4[%c0_72, %c0_73, %c24_74] : memref<1x8x32xf32, #tpu.memory_space<vmem>>, vector<1x8x8xf32>
    %93 = vector.shape_cast %92 : vector<1x8x8xf32> to vector<8x8xf32>
    %c0_75 = arith.constant 0 : index
    %c0_76 = arith.constant 0 : index
    %c24_77 = arith.constant 24 : index
    %94 = vector.load %arg5[%c0_75, %c0_76, %c24_77] : memref<1x8x32xf32, #tpu.memory_space<vmem>>, vector<1x8x8xf32>
    %95 = vector.shape_cast %94 : vector<1x8x8xf32> to vector<8x8xf32>
    %cst_78 = arith.constant dense<0.000000e+00> : vector<8x8xf32>
    %96 = tpu.matmul %91, %93, %cst_78 {dimension_numbers = #tpu.dot_dimension_numbers<[1], [1], [0], [0], [0, 0, 1, 0], [], []>} : vector<8x8xf32>, vector<8x8xf32>, vector<8x8xf32> -> vector<8x8xf32>
    %c0_79 = arith.constant 0 : index
    %c3 = arith.constant 3 : index
    %97 = vector.load %arg7[%c0_79, %c3] : memref<8x4xf32, #tpu.memory_space<vmem>>, vector<8x1xf32>
    %cst_80 = arith.constant dense<0xFF800000> : vector<8xf32>
    %98 = vector.multi_reduction <maximumf>, %96, %cst_80 [1] : vector<8x8xf32> to vector<8xf32>
    %99 = vector.shape_cast %98 : vector<8xf32> to vector<8x1xf32>
    %100 = arith.maximumf %97, %99 : vector<8x1xf32>
    %101 = arith.subf %97, %100 : vector<8x1xf32>
    %102 = math.exp %101 : vector<8x1xf32>
    %103 = vector.broadcast %100 : vector<8x1xf32> to vector<8x8xf32>
    %104 = arith.subf %96, %103 : vector<8x8xf32>
    %105 = math.exp %104 : vector<8x8xf32>
    %c0_81 = arith.constant 0 : index
    %c3_82 = arith.constant 3 : index
    %106 = vector.load %arg8[%c0_81, %c3_82] : memref<8x4xf32, #tpu.memory_space<vmem>>, vector<8x1xf32>
    %107 = arith.mulf %102, %106 : vector<8x1xf32>
    %cst_83 = arith.constant dense<0.000000e+00> : vector<8xf32>
    %108 = vector.multi_reduction <add>, %105, %cst_83 [1] : vector<8x8xf32> to vector<8xf32>
    %109 = vector.shape_cast %108 : vector<8xf32> to vector<8x1xf32>
    %110 = arith.addf %107, %109 : vector<8x1xf32>
    %c0_84 = arith.constant 0 : index
    %c3_85 = arith.constant 3 : index
    %111 = vector.load %arg8[%c0_84, %c3_85] : memref<8x4xf32, #tpu.memory_space<vmem>>, vector<8x1xf32>
    tpu.vector_store %arg8[%c0_84, %c3_85], %110 {strides = array<i32>} : memref<8x4xf32, #tpu.memory_space<vmem>>, vector<8x1xf32>,
    %c0_86 = arith.constant 0 : index
    %c24_87 = arith.constant 24 : index
    %112 = vector.load %arg9[%c0_86, %c24_87] : memref<8x32xf32, #tpu.memory_space<vmem>>, vector<8x8xf32>
    %113 = vector.broadcast %102 : vector<8x1xf32> to vector<8x8xf32>
    %114 = arith.mulf %113, %112 : vector<8x8xf32>
    %cst_88 = arith.constant dense<0.000000e+00> : vector<8x8xf32>
    %115 = tpu.matmul %105, %95, %cst_88 {dimension_numbers = #tpu.dot_dimension_numbers<[1], [0], [0], [1], [0, 0, 1, 1], [], []>} : vector<8x8xf32>, vector<8x8xf32>, vector<8x8xf32> -> vector<8x8xf32>
    %116 = arith.addf %114, %115 : vector<8x8xf32>
    %c0_89 = arith.constant 0 : index
    %c24_90 = arith.constant 24 : index
    %117 = vector.load %arg9[%c0_89, %c24_90] : memref<8x32xf32, #tpu.memory_space<vmem>>, vector<8x8xf32>
    tpu.vector_store %arg9[%c0_89, %c24_90], %116 {strides = array<i32>} : memref<8x32xf32, #tpu.memory_space<vmem>>, vector<8x8xf32>,
    %c0_91 = arith.constant 0 : index
    %c3_92 = arith.constant 3 : index
    %118 = vector.load %arg7[%c0_91, %c3_92] : memref<8x4xf32, #tpu.memory_space<vmem>>, vector<8x1xf32>
    tpu.vector_store %arg7[%c0_91, %c3_92], %100 {strides = array<i32>} : memref<8x4xf32, #tpu.memory_space<vmem>>, vector<8x1xf32>,
    %c0_i32_93 = arith.constant 0 : i32
    %119 = arith.cmpi eq, %arg2, %c0_i32_93 : i32
    %120 = arith.extui %119 : i1 to i32
    %c0_i32_94 = arith.constant 0 : i32
    %121 = arith.cmpi ne, %120, %c0_i32_94 : i32
    scf.if %121 {
      %c0_95 = arith.constant 0 : index
      %c0_96 = arith.constant 0 : index
      %122 = vector.load %arg8[%c0_95, %c0_96] : memref<8x4xf32, #tpu.memory_space<vmem>>, vector<8x1xf32>
      %cst_97 = arith.constant 1.000000e+00 : f32
      %123 = vector.broadcast %cst_97 : f32 to vector<8x1xf32>
      %124 = arith.divf %123, %122 : vector<8x1xf32>
      %c0_98 = arith.constant 0 : index
      %c0_99 = arith.constant 0 : index
      %125 = vector.load %arg9[%c0_98, %c0_99] : memref<8x32xf32, #tpu.memory_space<vmem>>, vector<8x8xf32>
      %126 = vector.broadcast %124 : vector<8x1xf32> to vector<8x8xf32>
      %127 = arith.mulf %125, %126 : vector<8x8xf32>
      %c0_100 = arith.constant 0 : index
      %c0_101 = arith.constant 0 : index
      %128 = vector.load %arg9[%c0_100, %c0_101] : memref<8x32xf32, #tpu.memory_space<vmem>>, vector<8x8xf32>
      tpu.vector_store %arg9[%c0_100, %c0_101], %127 {strides = array<i32>} : memref<8x32xf32, #tpu.memory_space<vmem>>, vector<8x8xf32>,
      %c0_102 = arith.constant 0 : index
      %c1_103 = arith.constant 1 : index
      %129 = vector.load %arg8[%c0_102, %c1_103] : memref<8x4xf32, #tpu.memory_space<vmem>>, vector<8x1xf32>
      %cst_104 = arith.constant 1.000000e+00 : f32
      %130 = vector.broadcast %cst_104 : f32 to vector<8x1xf32>
      %131 = arith.divf %130, %129 : vector<8x1xf32>
      %c0_105 = arith.constant 0 : index
      %c8_106 = arith.constant 8 : index
      %132 = vector.load %arg9[%c0_105, %c8_106] : memref<8x32xf32, #tpu.memory_space<vmem>>, vector<8x8xf32>
      %133 = vector.broadcast %131 : vector<8x1xf32> to vector<8x8xf32>
      %134 = arith.mulf %132, %133 : vector<8x8xf32>
      %c0_107 = arith.constant 0 : index
      %c8_108 = arith.constant 8 : index
      %135 = vector.load %arg9[%c0_107, %c8_108] : memref<8x32xf32, #tpu.memory_space<vmem>>, vector<8x8xf32>
      tpu.vector_store %arg9[%c0_107, %c8_108], %134 {strides = array<i32>} : memref<8x32xf32, #tpu.memory_space<vmem>>, vector<8x8xf32>,
      %c0_109 = arith.constant 0 : index
      %c2_110 = arith.constant 2 : index
      %136 = vector.load %arg8[%c0_109, %c2_110] : memref<8x4xf32, #tpu.memory_space<vmem>>, vector<8x1xf32>
      %cst_111 = arith.constant 1.000000e+00 : f32
      %137 = vector.broadcast %cst_111 : f32 to vector<8x1xf32>
      %138 = arith.divf %137, %136 : vector<8x1xf32>
      %c0_112 = arith.constant 0 : index
      %c16_113 = arith.constant 16 : index
      %139 = vector.load %arg9[%c0_112, %c16_113] : memref<8x32xf32, #tpu.memory_space<vmem>>, vector<8x8xf32>
      %140 = vector.broadcast %138 : vector<8x1xf32> to vector<8x8xf32>
      %141 = arith.mulf %139, %140 : vector<8x8xf32>
      %c0_114 = arith.constant 0 : index
      %c16_115 = arith.constant 16 : index
      %142 = vector.load %arg9[%c0_114, %c16_115] : memref<8x32xf32, #tpu.memory_space<vmem>>, vector<8x8xf32>
      tpu.vector_store %arg9[%c0_114, %c16_115], %141 {strides = array<i32>} : memref<8x32xf32, #tpu.memory_space<vmem>>, vector<8x8xf32>,
      %c0_116 = arith.constant 0 : index
      %c3_117 = arith.constant 3 : index
      %143 = vector.load %arg8[%c0_116, %c3_117] : memref<8x4xf32, #tpu.memory_space<vmem>>, vector<8x1xf32>
      %cst_118 = arith.constant 1.000000e+00 : f32
      %144 = vector.broadcast %cst_118 : f32 to vector<8x1xf32>
      %145 = arith.divf %144, %143 : vector<8x1xf32>
      %c0_119 = arith.constant 0 : index
      %c24_120 = arith.constant 24 : index
      %146 = vector.load %arg9[%c0_119, %c24_120] : memref<8x32xf32, #tpu.memory_space<vmem>>, vector<8x8xf32>
      %147 = vector.broadcast %145 : vector<8x1xf32> to vector<8x8xf32>
      %148 = arith.mulf %146, %147 : vector<8x8xf32>
      %c0_121 = arith.constant 0 : index
      %c24_122 = arith.constant 24 : index
      %149 = vector.load %arg9[%c0_121, %c24_122] : memref<8x32xf32, #tpu.memory_space<vmem>>, vector<8x8xf32>
      tpu.vector_store %arg9[%c0_121, %c24_122], %148 {strides = array<i32>} : memref<8x32xf32, #tpu.memory_space<vmem>>, vector<8x8xf32>,
      %c0_123 = arith.constant 0 : index
      %c0_124 = arith.constant 0 : index
      %150 = vector.load %arg9[%c0_123, %c0_124] : memref<8x32xf32, #tpu.memory_space<vmem>>, vector<8x32xf32>
      %c0_125 = arith.constant 0 : index
      %c0_126 = arith.constant 0 : index
      %c0_127 = arith.constant 0 : index
      %151 = vector.load %arg6[%c0_125, %c0_126, %c0_127] : memref<1x8x32xf32, #tpu.memory_space<vmem>>, vector<1x8x32xf32>
      %152 = vector.shape_cast %151 : vector<1x8x32xf32> to vector<8x32xf32>
      %153 = vector.shape_cast %150 : vector<8x32xf32> to vector<1x8x32xf32>
      tpu.vector_store %arg6[%c0_125, %c0_126, %c0_127], %153 {strides = array<i32>} : memref<1x8x32xf32, #tpu.memory_space<vmem>>, vector<1x8x32xf32>,
    } else {
    }
    return
  }
  func.func @transform_0(%arg0: i32, %arg1: i32, %arg2: i32) -> (i32, i32, i32) {
    %c0_i32 = arith.constant 0 : i32
    %c0_i32_0 = arith.constant 0 : i32
    return %arg0, %arg1, %c0_i32 : i32, i32, i32
  }
  func.func @transform_1(%arg0: i32, %arg1: i32, %arg2: i32) -> (i32, i32, i32) {
    %c0_i32 = arith.constant 0 : i32
    %c0_i32_0 = arith.constant 0 : i32
    return %arg0, %arg2, %c0_i32 : i32, i32, i32
  }
  func.func @transform_2(%arg0: i32, %arg1: i32, %arg2: i32) -> (i32, i32, i32) {
    %c0_i32 = arith.constant 0 : i32
    %c0_i32_0 = arith.constant 0 : i32
    return %arg0, %arg2, %c0_i32 : i32, i32, i32
  }
  func.func @transform_3(%arg0: i32, %arg1: i32, %arg2: i32) -> (i32, i32, i32) {
    %c0_i32 = arith.constant 0 : i32
    %c0_i32_0 = arith.constant 0 : i32
    return %arg0, %arg1, %c0_i32 : i32, i32, i32
  }
}

</mosaic_0001>

<bundles_post_ra>
// kernel: multi_head_attention.4
= control target key start
LH: loop header
LB: loop body
LE: loop exit
PB: predicated region body
PF: predicated region fallthrough
CT: control target
= control target key end

     0   :  { %8 = vsyncpa [#allocation3], 0  ;;  %s289_s0 = inlined_call_operand.hbm [shape: f32[16,32], index: 0, kind: input, shape index: {}]   ;;  %s290_s1 = inlined_call_operand.hbm [shape: f32[32,32], index: 1, kind: input, shape index: {}]   ;;  %s291_s2 = inlined_call_operand.hbm [shape: f32[1,32], index: 2, kind: input, shape index: {}]   ;;  %s292_s3 = inlined_call_operand.vmem [shape: f32[16,32], index: 3, kind: output, shape index: {}]  }
   0x1   :  { %9 = vsyncpa [#allocation5], 0  ;;  %s245_s12 = smov [#allocation4]   ;;  %s246_s14 = smov [#allocation2]  }
   0x2   :  { %s27_s13 = sshll.u32 %s245_s12, 4  ;;  %s15_s15 = sshll.u32 %s246_s14, 4  ;;  %s28_s13 = int_to_ptr.vmem [resolvable:$true] %s27_s13  ;;  %s16_s15 = int_to_ptr.vmem [resolvable:$true] %s15_s15 }
   0x3   :  { %s189_s16 = scalar_lea.vmem %s28_s13, 512  ;;  %p194_p1 = scmp.lt.s32.totalorder %s28_s13, %s28_s13 }
   0x4   :  { %p190_p0 = scmp.ne.s32.totalorder %s28_s13, %s189_s16  ;;  %p195_p2 = scmp.lt.s32.totalorder %s189_s16, %s189_s16 }
   0x6   :  { %p196_p3 = por %p195_p2, %p194_p1 }
   0x8   :  { %p197_p4 = pnand %p196_p3, %p190_p0 }
   0xa   :  { %200 = shalt.err (!%p197_p4)
}
   0xb   :  { %s247_s17 = smov 128   ;;  %s248_s18 = smov 8  }
   0xc   :  { %33 = dma.hbm_to_vmem [thread:$0]  %s290_s1, 512, %s28_s13, [#allocation5], %s247_s17, %s247_s17, %s248_s18  }
   0xd   :  { %s209_s21 = scalar_lea.vmem %s16_s15, 256  ;;  %p214_p6 = scmp.lt.s32.totalorder %s16_s15, %s16_s15 }
   0xe   :  { %p210_p5 = scmp.ne.s32.totalorder %s16_s15, %s209_s21  ;;  %p215_p7 = scmp.lt.s32.totalorder %s209_s21, %s209_s21 }
  0x10   :  { %p216_p8 = por %p215_p7, %p214_p6 }
  0x12   :  { %p217_p9 = pnand %p216_p8, %p210_p5 }
  0x14   :  { %220 = shalt.err (!%p217_p9)
}
  0x15   :  { %21 = dma.hbm_to_vmem [thread:$0]  %s289_s0, 256, %s16_s15, [#allocation3], %s247_s17, %s247_s17, %s248_s18  }
  0x16   :  { %s249_s24 = smov [#allocation6]  }
  0x17   :  { %s40_s25 = sshll.u32 %s249_s24, 4  ;;  %s41_s25 = int_to_ptr.vmem [resolvable:$true] %s40_s25 }
  0x18   :  { %s229_s26 = scalar_lea.vmem %s41_s25, 16  ;;  %s233_s27 = scalar_lea.vmem %s41_s25, 32 }
  0x19   :  { %p230_p10 = scmp.ne.s32.totalorder %s41_s25, %s229_s26  ;;  %p234_p11 = scmp.lt.s32.totalorder %s41_s25, %s41_s25 }
  0x1a   :  { %p235_p12 = scmp.lt.s32.totalorder %s233_s27, %s229_s26 }
  0x1c   :  { %p236_p13 = por %p235_p12, %p234_p11 }
  0x1e   :  { %p237_p0 = pnand %p236_p13, %p230_p10 }
  0x20   :  { %240 = shalt.err (!%p237_p0)
}
  0x21   :  { %43 = dma.hbm_to_vmem [thread:$0]  %s291_s2, 16, %s41_s25, [#allocation5]  }
  0x22   :  { %241 = dma.done.wait [#allocation3], 256  }
  0x23   :  { %242 = vsyncadd [#allocation3], 4294967040 }
  0x24   :  { %243 = dma.done.wait [#allocation5], 528  }
  0x25   :  { %244 = vsyncadd [#allocation5], 4294966768  ;;  %vm66_vm0 = vcmask 261120   ;;  %v58_v0 = vld [vmem:[#allocation4 + $0x18] sm:$0xff]  ;;  %v57_v1 = vld [vmem:[#allocation4 + $0x10] sm:$0xff] }
  0x26   :  { %165 = vmatprep.subr.mxu0 %v58_v0  ;;  %v53_v2 = vld [vmem:[#allocation2] sm:$0xff]  ;;  %v56_v3 = vld [vmem:[#allocation4 + $0x8] sm:$0xff]  ;;  %v55_v4 = vld [vmem:[#allocation4] sm:$0xff] }
  0x27   :  { %166 = vmatpush3.msra.mxu0 %v58_v0  ;;  %173 = vmatprep.mubr.msk.f32.mxu0 %vm66_vm0, %v53_v2  ;;  %v54_v5 = vld [vmem:[#allocation2 + $0x8] sm:$0xff]  ;;  %v156_v6 = vld [vmem:[#allocation6] ss:$0 sm:$0xff] }
  0x28   :  { %167 = vmatprep.subr.mxu0 %v57_v1 }
  0x29   :  { %168 = vmatpush3.msra.mxu0 %v57_v1 }
  0x2a   :  { %169 = vmatprep.subr.mxu0 %v56_v3 }
  0x2b   :  { %170 = vmatpush3.msra.mxu0 %v56_v3 }
  0x2c   :  { %171 = vmatprep.subr.mxu0 %v55_v4 }
  0x2d   :  { %172 = vmatpush3.msra.mxu0 %v55_v4 }
  0x2e   :  { %174 = vmatmul.mubr.msk.f32.vlgmr.msra.gmra.mxu0 %vm66_vm0, %v54_v5 }
  0xee   :  { %v175_v7 = vpop.f32.mrf.mxu0 }
  0xef   :  { %v145_v8 = vadd.f32 %v175_v7, %v156_v6 }
  0xf0   :  { %v139_v9 = vpop.f32.mrf.mxu0 }
  0xf1   :  { %149 = vst.msk [vmem:[%s292_s3 + $0x8] sm:$0xff] %vm66_vm0, %v145_v8  ;;  %v140_v10 = vadd.f32 %v156_v6, %v139_v9 }
  0xf3   :  { %148 = vst.msk [vmem:[%s292_s3] sm:$0xff] %vm66_vm0, %v140_v10 }
  0xf4   :  { %154 = vsyncpa [#allocation3], 1 }
  0xf5   :  { %155 = vsyncpa [#allocation5], 1 }

// kernel: multi_head_attention.7
= control target key start
LH: loop header
LB: loop body
LE: loop exit
PB: predicated region body
PF: predicated region fallthrough
CT: control target
= control target key end

     0   :  { %vm28_vm0 = vcmask 261120   ;;  %s224_s0 = inlined_call_operand.vmem [shape: f32[16,32], index: 0, kind: input, shape index: {}]   ;;  %s225_s1 = inlined_call_operand.vmem [shape: f32[32,32], index: 1, kind: input, shape index: {}]   ;;  %s226_s2 = inlined_call_operand.vmem [shape: f32[1,32], index: 2, kind: input, shape index: {}]   ;;  %s227_s3 = inlined_call_operand.hbm [shape: f32[16,32], index: 3, kind: output, shape index: {}]  }
   0x1   :  { %v20_v0 = vld [vmem:[%s225_s1 + $0x18] sm:$0xff]  ;;  %v19_v1 = vld [vmem:[%s225_s1 + $0x10] sm:$0xff]  ;;  %v15_v2 = vld [vmem:[%s224_s0] sm:$0xff] }
   0x2   :  { %137 = vmatprep.subr.mxu0 %v20_v0  ;;  %v18_v3 = vld [vmem:[%s225_s1 + $0x8] sm:$0xff]  ;;  %145 = vmatprep.mubr.msk.f32.mxu0 %vm28_vm0, %v15_v2 }
   0x3   :  { %138 = vmatpush3.msra.mxu0 %v20_v0 }
   0x4   :  { %8 = vsyncpa [#allocation3], 0  ;;  %139 = vmatprep.subr.mxu0 %v19_v1  ;;  %v17_v4 = vld [vmem:[%s225_s1] sm:$0xff]  ;;  %v16_v5 = vld [vmem:[%s224_s0 + $0x8] sm:$0xff]  ;;  %s173_s26 = smov [#allocation2]  }
   0x5   :  { %140 = vmatpush3.msra.mxu0 %v19_v1  ;;  %v128_v6 = vld [vmem:[%s226_s2] ss:$0 sm:$0xff]  ;;  %s117_s27 = sshll.u32 %s173_s26, 4  ;;  %s118_s27 = int_to_ptr.vmem [resolvable:$true] %s117_s27 }
   0x6   :  { %141 = vmatprep.subr.mxu0 %v18_v3  ;;  %s151_s0 = scalar_lea.vmem %s118_s27, 256  ;;  %p156_p1 = scmp.lt.s32.totalorder %s118_s27, %s118_s27 }
   0x7   :  { %142 = vmatpush3.msra.mxu0 %v18_v3  ;;  %p152_p0 = scmp.ne.s32.totalorder %s118_s27, %s151_s0  ;;  %p157_p2 = scmp.lt.s32.totalorder %s151_s0, %s151_s0 }
   0x8   :  { %143 = vmatprep.subr.mxu0 %v17_v4 }
   0x9   :  { %144 = vmatpush3.msra.mxu0 %v17_v4  ;;  %p158_p3 = por %p157_p2, %p156_p1 }
   0xa   :  { %146 = vmatmul.mubr.msk.f32.vlgmr.msra.gmra.mxu0 %vm28_vm0, %v16_v5 }
   0xb   :  { %p159_p4 = pnand %p158_p3, %p152_p0 }
  0xca   :  { %v147_v7 = vpop.f32.mrf.mxu0 }
  0xcb   :  { %v107_v8 = vadd.f32 %v147_v7, %v128_v6 }
  0xcc   :  { %v101_v9 = vpop.f32.mrf.mxu0 }
  0xcd   :  { %111 = vst.msk [vmem:[#allocation2 + $0x8] sm:$0xff] %vm28_vm0, %v107_v8  ;;  %v102_v10 = vadd.f32 %v128_v6, %v101_v9 }
  0xcf   :  { %110 = vst.msk [vmem:[#allocation2] sm:$0xff] %vm28_vm0, %v102_v10 }
  0xd0   :  { %162 = shalt.err (!%p159_p4)
}
  0xd1   :  { %s174_s1 = smov 128   ;;  %s175_s2 = smov 8  }
  0xd2   :  { %123 = dma.vmem_to_hbm [thread:$0]  %s118_s27, 256, %s227_s3, [#allocation3], %s174_s1, %s174_s1, %s175_s2  }
  0xd3   :  { %171 = dma.done.wait [#allocation3], 256  }
  0xd4   :  { %172 = vsyncadd [#allocation3], 4294967040 }
  0xd5   :  { %127 = vsyncpa [#allocation3], 1 }

// kernel: multi_head_attention.5
= control target key start
LH: loop header
LB: loop body
LE: loop exit
PB: predicated region body
PF: predicated region fallthrough
CT: control target
= control target key end

     0   :  { %vm25_vm0 = vcmask 261120   ;;  %s327_s1 = inlined_call_operand.vmem [shape: f32[32,32], index: 1, kind: input, shape index: {}]   ;;  %s328_s2 = inlined_call_operand.vmem [shape: f32[32,32], index: 2, kind: input, shape index: {}]   ;;  %s329_s0 = inlined_call_operand.vmem [shape: f32[16,32], index: 0, kind: input, shape index: {}]   ;;  %s330_s3 = inlined_call_operand.vmem [shape: f32[1,32], index: 3, kind: input, shape index: {}]   ;;  %s331_s4 = inlined_call_operand.vmem [shape: f32[16,32], index: 4, kind: output, shape index: {0}]   ;;  %s332_s5 = inlined_call_operand.vmem [shape: f32[16,32], index: 5, kind: output, shape index: {1}]  }
   0x1   :  { %v24_v0 = vld [vmem:[%s327_s1 + $0x18] sm:$0xff]  ;;  %v23_v2 = vld [vmem:[%s327_s1 + $0x10] sm:$0xff]  ;;  %v22_v4 = vld [vmem:[%s327_s1 + $0x8] sm:$0xff] }
   0x2   :  { %v112_v1 = vld [vmem:[%s328_s2 + $0x18] sm:$0xff]  ;;  %222 = vmatprep.subr.mxu0 %v24_v0  ;;  %v111_v3 = vld [vmem:[%s328_s2 + $0x10] sm:$0xff]  ;;  %v110_v5 = vld [vmem:[%s328_s2 + $0x8] sm:$0xff] }
   0x3   :  { %233 = vmatprep.subr.mxu1 %v112_v1  ;;  %223 = vmatpush3.msra.mxu0 %v24_v0  ;;  %v21_v6 = vld [vmem:[%s327_s1] sm:$0xff]  ;;  %v20_v9 = vld [vmem:[%s329_s0 + $0x8] sm:$0xff] }
   0x4   :  { %234 = vmatpush3.msra.mxu1 %v112_v1  ;;  %224 = vmatprep.subr.mxu0 %v23_v2  ;;  %v109_v7 = vld [vmem:[%s328_s2] sm:$0xff] }
   0x5   :  { %235 = vmatprep.subr.mxu1 %v111_v3  ;;  %225 = vmatpush3.msra.mxu0 %v23_v2  ;;  %v19_v8 = vld [vmem:[%s329_s0] sm:$0xff] }
   0x6   :  { %236 = vmatpush3.msra.mxu1 %v111_v3  ;;  %226 = vmatprep.subr.mxu0 %v22_v4  ;;  %v207_v10 = vld [vmem:[%s330_s3] ss:$0 sm:$0xff] }
   0x7   :  { %237 = vmatprep.subr.mxu1 %v110_v5  ;;  %227 = vmatpush3.msra.mxu0 %v22_v4 }
   0x8   :  { %238 = vmatpush3.msra.mxu1 %v110_v5  ;;  %228 = vmatprep.subr.mxu0 %v21_v6 }
   0x9   :  { %239 = vmatprep.subr.mxu1 %v109_v7  ;;  %229 = vmatpush3.msra.mxu0 %v21_v6 }
   0xa   :  { %230 = vmatprep.mubr.msk.f32.mxu0 %vm25_vm0, %v19_v8  ;;  %240 = vmatpush3.msra.mxu1 %v109_v7 }
   0xb   :  { %241 = vmatprep.mubr.msk.f32.mxu1 %vm25_vm0, %v19_v8  ;;  %231 = vmatmul.mubr.msk.f32.vlgmr.msra.gmra.mxu0 %vm25_vm0, %v20_v9 }
   0xc   :  { %242 = vmatmul.mubr.msk.f32.vlgmr.msra.gmra.mxu1 %vm25_vm0, %v20_v9 }
  0xcb   :  { %v232_v11 = vpop.f32.mrf.mxu0 }
  0xcc   :  { %v243_v12 = vpop.f32.mrf.mxu1  ;;  %108 = vst.msk [vmem:[%s331_s4 + $0x8] sm:$0xff] %vm25_vm0, %v232_v11 }
  0xcd   :  { %v192_v13 = vadd.f32 %v243_v12, %v207_v10  ;;  %v98_v14 = vpop.f32.mrf.mxu0 }
  0xce   :  { %v186_v15 = vpop.f32.mrf.mxu1  ;;  %107 = vst.msk [vmem:[%s331_s4] sm:$0xff] %vm25_vm0, %v98_v14 }
  0xcf   :  { %196 = vst.msk [vmem:[%s332_s5 + $0x8] sm:$0xff] %vm25_vm0, %v192_v13  ;;  %v187_v16 = vadd.f32 %v207_v10, %v186_v15 }
  0xd1   :  { %195 = vst.msk [vmem:[%s332_s5] sm:$0xff] %vm25_vm0, %v187_v16 }

// kernel: multi_head_attention.6
= control target key start
LH: loop header
LB: loop body
LE: loop exit
PB: predicated region body
PF: predicated region fallthrough
CT: control target
= control target key end

     0   :  { %s1414_s12 = smov 0   ;;  %s1416_s13 = smov 0   ;;  %s1590_s0 = inlined_call_operand.vmem [shape: f32[2,8,32], index: 0, kind: input, shape index: {}]   ;;  %s1591_s1 = inlined_call_operand.vmem [shape: f32[2,8,32], index: 1, kind: input, shape index: {}]   ;;  %s1592_s2 = inlined_call_operand.vmem [shape: f32[2,8,32], index: 2, kind: input, shape index: {}]   ;;  %s1593_s3 = inlined_call_operand.vmem [shape: f32[2,8,32], index: 3, kind: output, shape index: {}]  }
   0x1   :  { %s1418_s14 = smov 0  }
   0x2 LB: > { %s32_s15 = sadd.s32 1, %s1375_s13  ;;  %p1214_p0 = scmp.ge.s32.totalorder %s1379_s14, 1  ;;  %s1379_s14 = sphi %s1418_s14, %s13_s14   ;;  %s1375_s13 = sphi %s1416_s13, %s1595_s13   ;;  %s1371_s12 = sphi %s1414_s12, %s1594_s12  }
   0x3   : > { %p34_p1 = scmp.ge.s32.totalorder %s32_s15, 2  ;;  %p190_p2 = scmp.lt.s32.totalorder %s1379_s14, 3 }
   0x5   : > { %s1597_s15 = smov (%p34_p1, %s32_s15), 0  ;;  %p191_p3 = pnand %p1214_p0, %p190_p2 }
   0x6   : > { %p232_p4 = scmp.lt.s32.totalorder (!%p191_p3), %s1371_s12, 1  ;;  %s1385_s23 = smov (!%p191_p3), 120  }
   0x7   : > { %194 = sbr.rel (%p191_p3) target bundleno = 1361 (0x551), region = 32  ;;  %s1386_s24 = smov (!%p191_p3), 112  }
   0x8   : > { %s1387_s25 = smov (!%p191_p3), 104   ;;  %s1391_s29 = smov (!%p191_p3), 8  }
   0x9   : > { %s1392_s30 = smov (!%p191_p3), 16   ;;  %s1393_s4 = smov (!%p191_p3), 24  }
   0xc   : > { %v1381_v0 = vmov 0.0   ;;  %vm1382_vm0 = vmmov 0   ;;  %s1599_s12 = smov (!%p232_p4, %s1371_s12), 1  ;;  %vm272_vm1 = vcmask 64512   ;;  %vm264_vm2 = vcmask 31744  }
   0xd   : > { %1249 = vmatprep.subr.mxu0 %v1381_v0  ;;  %1251 = vmatprep.mubr.msk.f32.mxu0 %vm1382_vm0, %v1381_v0  ;;  %s1438_s16 = sshll.u32 %s1599_s12, 3  ;;  %v1383_v3 = vmov -1e+30   ;;  %266 = vst.msk [vmem:[#allocation3] sm:$0xff] %vm264_vm2, %v1381_v0  ;;  %v1384_v7 = vmov 0   ;;  %vm371_vm3 = vcmask 7168  }
   0xe   : > { %1254 = vmatprep.subr.mxu1 %v1381_v0  ;;  %1256 = vmatprep.mubr.msk.f32.mxu1 %vm1382_vm0, %v1381_v0  ;;  %s245_s19 = scalar_lea.vmem %s1591_s1, %s1438_s16  ;;  %s238_s22 = scalar_lea.vmem %s1590_s0, %s1438_s16  ;;  %265 = vst.msk [vmem:[#allocation2] sm:$0xff] %vm264_vm2, %v1383_v3  ;;  %v1388_v34 = vmov 1   ;;  %v1389_v35 = vmov 2   ;;  %vm561_vm4 = vcmask 15368   ;;  %vm267_vm5 = vcmask 261120  }
   0xf   : > { %v270_v1 = vld [vmem:[%s245_s19] sm:$0xff]  ;;  %1326 = vset.pattern.permute.xlu0 %v1384_v7  ;;  %s252_s28 = scalar_lea.vmem %s1592_s2, %s1438_s16  ;;  %1327 = vset.pattern.permute.xlu1 %v1388_v34  ;;  %268 = vst.msk [vmem:[#allocation4] sm:$0xff] %vm267_vm5, %v1381_v0  ;;  %v1390_v42 = vmov 3   ;;  %vm760_vm6 = vcmask 23568   ;;  %vm959_vm7 = vcmask 31768   ;;  %vm652_vm8 = vcmask 130112   ;;  %s259_s7 = scalar_lea.vmem %s1593_s3, %s1438_s16 }
  0x10   : > { %1250 = vmatpush3.xpose.msk.msra.mxu0 %vm272_vm1, %v270_v1  ;;  %v269_v2 = vld [vmem:[%s238_s22] sm:$0xff]  ;;  %463 = vrot.lane.b32.xlu1 %v270_v1, %s1385_s23  ;;  %vm851_vm9 = vcmask 195712   ;;  %vm1050_vm10 = vcmask 261312  }
  0x11   : > { %1264 = vmatprep.subr.mxu0 %v1381_v0  ;;  %v1467_v12 = vld [vmem:[%s252_s28] sm:$0xff] }
  0x12   : > { %1255 = vmatpush3.msra.mxu1 %v1467_v12 }
  0x13   : > { %1252 = vmatmul.mubr.msk.f32.vlgmr.msra.gmra.mxu0 %vm272_vm1, %v269_v2  ;;  %1259 = vmatprep.subr.mxu1 %v1381_v0 }
  0x14   : > { %1266 = vmatprep.mubr.msk.f32.mxu0 %vm1382_vm0, %v1381_v0  ;;  %460 = vrot.lane.b32.xlu1 %v269_v2, %s1385_s23 }
  0x15   : > { %v349_v8 = vld [vmem:[#allocation2] sm:$0xff] }
  0x16   : > { %v373_v59 = vld [vmem:[#allocation4] sm:$0xff] }
  0x18   : > { %662 = vrot.lane.b32.xlu1 %v270_v1, %s1386_s24 }
  0x1c   : > { %659 = vrot.lane.b32.xlu1 %v269_v2, %s1386_s24 }
  0x20   : > { %861 = vrot.lane.b32.xlu1 %v270_v1, %s1387_s25 }
  0x24   : > { %858 = vrot.lane.b32.xlu1 %v269_v2, %s1387_s25 }
  0x82   : > { %v464_v14 = vpop.permute.xlu1 %463 }
  0x86   : > { %v461_v17 = vpop.permute.xlu1 %460 }
  0x8a   : > { %v663_v18 = vpop.permute.xlu1 %662 }
  0x8e   : > { %v660_v20 = vpop.permute.xlu1 %659 }
  0x92   : > { %v862_v21 = vpop.permute.xlu1 %861 }
  0x96   : > { %v859_v22 = vpop.permute.xlu1 %858 }
  0xd3   : > { %v345_v4 = vpop.f32.mrf.mxu0 }
  0xd4   : > { %v350_v5 = vsel %vm272_vm1, %v345_v4, -inf }
  0xd5   : > { %351 = vmax.xlane.f32.xlu0 %v350_v5  ;;  %v1253_v6 = vpop.f32.mrf.mxu0 }
 0x15e   : > { %v352_v9 = vpop.xlane.xlu0 %351 }
 0x15f   : > { %v353_v10 = vmax.f32 %v349_v8, %v352_v9 }
 0x161   : > { %v354_v11 = vsub.f32 %v349_v8, %v353_v10  ;;  %455 = vst.msk [vmem:[#allocation2] sm:$0xff] %vm371_vm3, %v353_v10  ;;  %359 = vperm.xlu0 %1326, %v353_v10  }
 0x163   : > { %v355_v36 = vmul.f32 1.442695, %v354_v11 }
 0x165   : > { %1328 = vset.pattern.permute.xlu0 %v1389_v35 }
 0x168   : > { %v1499_v38 = vld [vmem:[#allocation2] sm:$0xff] }
 0x1dc   : > { %v360_v13 = vpop.permute.xlu0 %359 }
 0x1dd   : > { %v362_v15 = vsub.f32 %v345_v4, %v360_v13 }
 0x1df   : > { %v363_v16 = vmul.f32 1.442695, %v362_v15 }
 0x1e1   : > { %1339 = vpow2.f32 %v363_v16 }
 0x1e2   : > { %1341 = vpow2.f32 %v355_v36 }
 0x1ee   : > { %v1471_v19 = vpop.eup %1339 }
 0x1ef   : > { %1257 = vmatmul.mubr.msk.f32.vlgmr.msra.gmra.mxu1 %vm272_vm1, %v1471_v19  ;;  %v1515_v46 = vpop.eup %1341  ;;  %v367_v51 = vsel %vm272_vm1, %v1471_v19, 0.0 }
 0x1f0   : > { %1260 = vmatpush3.xpose.msk.msra.mxu1 %vm272_vm1, %v464_v14  ;;  %1261 = vmatprep.mubr.msk.f32.mxu1 %vm1382_vm0, %v1381_v0 }
 0x1f1   : > { %1269 = vmatprep.subr.mxu1 %v1381_v0 }
 0x1f3   : > { %1262 = vmatmul.mubr.msk.f32.vlgmr.msra.gmra.mxu1 %vm272_vm1, %v461_v17 }
 0x1f4   : > { %1270 = vmatpush3.xpose.msk.msra.mxu1 %vm272_vm1, %v663_v18  ;;  %1271 = vmatprep.mubr.msk.f32.mxu1 %vm1382_vm0, %v1381_v0 }
 0x1f5   : > { %1279 = vmatprep.subr.mxu1 %v1381_v0 }
 0x1f7   : > { %1272 = vmatmul.mubr.msk.f32.vlgmr.msra.gmra.mxu1 %vm272_vm1, %v660_v20 }
 0x1f8   : > { %1280 = vmatpush3.xpose.msk.msra.mxu1 %vm272_vm1, %v862_v21  ;;  %1281 = vmatprep.mubr.msk.f32.mxu1 %vm1382_vm0, %v1381_v0 }
 0x1fb   : > { %1282 = vmatmul.mubr.msk.f32.vlgmr.msra.gmra.mxu1 %vm272_vm1, %v859_v22 }
 0x2af   : > { %v1489_v23 = vpop.f32.mrf.mxu1 }
 0x2b1   : > { %v1258_v24 = vpop.f32.mrf.mxu1 }
 0x2b3   : > { %v535_v25 = vpop.f32.mrf.mxu1 }
 0x2b4   : > { %v540_v26 = vsel %vm272_vm1, %v535_v25, -inf }
 0x2b5   : > { %541 = vmax.xlane.f32.xlu1 %v540_v26  ;;  %v1263_v27 = vpop.f32.mrf.mxu1 }
 0x2b7   : > { %v734_v28 = vpop.f32.mrf.mxu1 }
 0x2b8   : > { %v739_v29 = vsel %vm272_vm1, %v734_v28, -inf }
 0x2b9   : > { %v1273_v30 = vpop.f32.mrf.mxu1  ;;  %740 = vmax.xlane.f32.xlu0 %v739_v29 }
 0x2bb   : > { %v1493_v31 = vpop.f32.mrf.mxu1 }
 0x2bc   : > { %v938_v32 = vsel %vm272_vm1, %v1493_v31, -inf }
 0x2bd   : > { %v1283_v33 = vpop.f32.mrf.mxu1  ;;  %939 = vmax.xlane.f32.xlu1 %v938_v32 }
 0x33e   : > { %v542_v37 = vpop.xlane.xlu1 %541 }
 0x33f   : > { %v1502_v39 = vmax.f32 %v1499_v38, %v542_v37 }
 0x341   : > { %v544_v40 = vsub.f32 %v1499_v38, %v1502_v39  ;;  %654 = vst.msk [vmem:[#allocation2] sm:$0xff] %vm561_vm4, %v1502_v39  ;;  %549 = vperm.xlu1 %1327, %v1502_v39  }
 0x342   : > { %v741_v41 = vpop.xlane.xlu0 %740 }
 0x345   : > { %571 = vrot.lane.b32.xlu1 %v1467_v12, %s1385_s23 }
 0x346   : > { %1329 = vset.pattern.permute.xlu1 %v1390_v42  ;;  %v940_v47 = vpop.xlane.xlu1 %939 }
 0x348   : > { %v738_v43 = vld [vmem:[#allocation2] sm:$0xff] }
 0x349   : > { %v742_v44 = vmax.f32 %v738_v43, %v741_v41 }
 0x34b   : > { %v743_v45 = vsub.f32 %v738_v43, %v742_v44  ;;  %853 = vst.msk [vmem:[#allocation2] sm:$0xff] %vm760_vm6, %v742_v44  ;;  %748 = vperm.xlu0 %1328, %v742_v44  }
 0x34d   : > { %v744_v5 = vmul.f32 1.442695, %v743_v45 }
 0x34f   : > { %1330 = vset.pattern.permute.xlu0 %v1384_v7 }
 0x350   : > { %376 = vperm.xlu0 %1330, %v1515_v46  }
 0x352   : > { %v1519_v48 = vld [vmem:[#allocation2] sm:$0xff] }
 0x353   : > { %v1522_v49 = vmax.f32 %v1519_v48, %v940_v47 }
 0x354   : > { %1332 = vset.pattern.permute.xlu0 %v1389_v35 }
 0x355   : > { %v942_v50 = vsub.f32 %v1519_v48, %v1522_v49  ;;  %1052 = vst.msk [vmem:[#allocation2] sm:$0xff] %vm959_vm7, %v1522_v49  ;;  %947 = vperm.xlu1 %1329, %v1522_v49  }
 0x359   : > { %770 = vrot.lane.b32.xlu1 %v1467_v12, %s1386_s24 }
 0x35a   : > { %1331 = vset.pattern.permute.xlu1 %v1388_v34 }
 0x35d   : > { %969 = vrot.lane.b32.xlu1 %v1467_v12, %s1387_s25  ;;  %v545_v12 = vmul.f32 1.442695, %v544_v40 }
 0x381   : > { %368 = vadd.xlane.f32.xlu1 %v367_v51 }
 0x3bc   : > { %v550_v52 = vpop.permute.xlu1 %549 }
 0x3bd   : > { %v552_v53 = vsub.f32 %v535_v25, %v550_v52 }
 0x3bf   : > { %v553_v54 = vmul.f32 1.442695, %v552_v53 }
 0x3c0   : > { %v572_v55 = vpop.permute.xlu1 %571 }
 0x3c1   : > { %1343 = vpow2.f32 %v553_v54  ;;  %1265 = vmatpush3.msra.mxu0 %v572_v55 }
 0x3c2   : > { %1274 = vmatprep.subr.mxu0 %v1381_v0 }
 0x3c6   : > { %v749_v56 = vpop.permute.xlu0 %748 }
 0x3c7   : > { %v751_v57 = vsub.f32 %v734_v28, %v749_v56 }
 0x3c9   : > { %v752_v58 = vmul.f32 1.442695, %v751_v57 }
 0x3cb   : > { %1345 = vpow2.f32 %v752_v58  ;;  %v377_v60 = vpop.permute.xlu0 %376 }
 0x3cc   : > { %v379_v61 = vmul.f32 %v377_v60, %v373_v59 }
 0x3ce   : > { %v1344_v62 = vpop.eup %1343  ;;  %v453_v63 = vadd.f32 %v1489_v23, %v379_v61  ;;  %v943_v23 = vmul.f32 1.442695, %v942_v50 }
 0x3cf   : > { %1267 = vmatmul.mubr.msk.f32.vlgmr.msra.gmra.mxu0 %vm272_vm1, %v1344_v62  ;;  %v557_v1 = vsel %vm272_vm1, %v1344_v62, 0.0 }
 0x3d0   : > { %454 = vst.msk [vmem:[#allocation4] sm:$0xff] %vm272_vm1, %v453_v63  ;;  %v948_v2 = vpop.permute.xlu1 %947  ;;  %558 = vadd.xlane.f32.xlu0 %v557_v1  ;;  %1276 = vmatprep.mubr.msk.f32.mxu0 %vm1382_vm0, %v1381_v0 }
 0x3d1   : > { %v950_v3 = vsub.f32 %v1493_v31, %v948_v2 }
 0x3d3   : > { %v951_v4 = vmul.f32 1.442695, %v950_v3 }
 0x3d4   : > { %v771_v6 = vpop.permute.xlu1 %770 }
 0x3d5   : > { %1347 = vpow2.f32 %v951_v4  ;;  %1275 = vmatpush3.msra.mxu0 %v771_v6 }
 0x3d6   : > { %1284 = vmatprep.subr.mxu0 %v1381_v0  ;;  %1349 = vpow2.f32 %v744_v5 }
 0x3d7   : > { %1351 = vpow2.f32 %v545_v12  ;;  %v563_v45 = vld [vmem:[#allocation4] sm:$0xff] }
 0x3d8   : > { %v1346_v8 = vpop.eup %1345  ;;  %v970_v9 = vpop.permute.xlu1 %969  ;;  %1353 = vpow2.f32 %v943_v23 }
 0x3d9   : > { %1277 = vmatmul.mubr.msk.f32.vlgmr.msra.gmra.mxu0 %vm272_vm1, %v1346_v8  ;;  %v756_v10 = vsel %vm272_vm1, %v1346_v8, 0.0 }
 0x3da   : > { %757 = vadd.xlane.f32.xlu1 %v756_v10  ;;  %1285 = vmatpush3.msra.mxu0 %v970_v9 }
 0x3db   : > { %1286 = vmatprep.mubr.msk.f32.mxu0 %vm1382_vm0, %v1381_v0  ;;  %v365_v0 = vld [vmem:[#allocation3] sm:$0xff] }
 0x3dc   : > { %v366_v16 = vmul.f32 %v1515_v46, %v365_v0 }
 0x3e2   : > { %v1348_v11 = vpop.eup %1347 }
 0x3e3   : > { %1287 = vmatmul.mubr.msk.f32.vlgmr.msra.gmra.mxu0 %vm272_vm1, %v1348_v11  ;;  %v955_v13 = vsel %vm272_vm1, %v1348_v11, 0.0  ;;  %v1350_v14 = vpop.eup %1349 }
 0x3e4   : > { %956 = vadd.xlane.f32.xlu1 %v955_v13  ;;  %v1352_v15 = vpop.eup %1351 }
 0x3e5   : > { %v1354_v28 = vpop.eup %1353 }
 0x3e6   : > { %765 = vperm.xlu0 %1332, %v1350_v14  }
 0x3ea   : > { %1338 = vset.pattern.permute.xlu0 %v1390_v42 }
 0x3f5   : > { %566 = vperm.xlu1 %1331, %v1352_v15  }
 0x3f9   : > { %1333 = vset.pattern.permute.xlu1 %v1390_v42 }
 0x40a   : > { %v369_v17 = vpop.xlane.xlu1 %368 }
 0x40b   : > { %v370_v18 = vadd.f32 %v369_v17, %v366_v16 }
 0x40d   : > { %372 = vst.msk [vmem:[#allocation3] sm:$0xff] %vm371_vm3, %v370_v18 }
 0x414   : > { %v555_v19 = vld [vmem:[#allocation3] sm:$0xff] }
 0x415   : > { %v556_v20 = vmul.f32 %v1352_v15, %v555_v19 }
 0x459   : > { %v559_v21 = vpop.xlane.xlu0 %558 }
 0x45a   : > { %v560_v22 = vadd.f32 %v559_v21, %v556_v20 }
 0x45c   : > { %562 = vst.msk [vmem:[#allocation3] sm:$0xff] %vm561_vm4, %v560_v22 }
 0x461   : > { %v766_v48 = vpop.permute.xlu0 %765 }
 0x463   : > { %v754_v24 = vld [vmem:[#allocation3] sm:$0xff]  ;;  %v758_v26 = vpop.xlane.xlu1 %757 }
 0x464   : > { %v755_v25 = vmul.f32 %v1350_v14, %v754_v24 }
 0x466   : > { %v759_v27 = vadd.f32 %v758_v26, %v755_v25 }
 0x468   : > { %761 = vst.msk [vmem:[#allocation3] sm:$0xff] %vm760_vm6, %v759_v27 }
 0x46d   : > { %v957_v31 = vpop.xlane.xlu1 %956 }
 0x46f   : > { %v953_v29 = vld [vmem:[#allocation3] sm:$0xff] }
 0x470   : > { %v954_v30 = vmul.f32 %v1354_v28, %v953_v29 }
 0x471   : > { %v567_v44 = vpop.permute.xlu1 %566 }
 0x472   : > { %v958_v32 = vadd.f32 %v957_v31, %v954_v30  ;;  %v569_v46 = vmul.f32 %v567_v44, %v563_v45 }
 0x474   : > { %960 = vst.msk [vmem:[#allocation3] sm:$0xff] %vm959_vm7, %v958_v32 }
 0x47b   : > { %v1056_v37 = vld [vmem:[#allocation3] sm:$0xff] }
 0x47c   : > { %1355 = vrcp.f32 %v1056_v37 }
 0x489   : > { %v1356_v43 = vpop.eup %1355 }
 0x48f   : > { %v643_v33 = vpop.f32.mrf.mxu0 }
 0x490   : > { %648 = vrot.lane.b32.xlu1 %v643_v33, %s1391_s29 }
 0x491   : > { %v1268_v36 = vpop.f32.mrf.mxu0 }
 0x499   : > { %v842_v38 = vpop.f32.mrf.mxu0 }
 0x49a   : > { %847 = vrot.lane.b32.xlu1 %v842_v38, %s1392_s30 }
 0x49b   : > { %v1278_v39 = vpop.f32.mrf.mxu0 }
 0x49e   : > { %964 = vperm.xlu1 %1333, %v1354_v28  }
 0x4a2   : > { %1334 = vset.pattern.permute.xlu1 %v1384_v7 }
 0x4a3   : > { %v1041_v40 = vpop.f32.mrf.mxu0 }
 0x4a4   : > { %1046 = vrot.lane.b32.xlu1 %v1041_v40, %s1393_s4 }
 0x4a5   : > { %v1288_v41 = vpop.f32.mrf.mxu0 }
 0x4a8   : > { %1062 = vperm.xlu1 %1334, %v1356_v43  }
 0x4ac   : > { %1335 = vset.pattern.permute.xlu1 %v1388_v34 }
 0x4ad   : > { %1073 = vperm.xlu1 %1335, %v1356_v43  }
 0x4b1   : > { %1336 = vset.pattern.permute.xlu1 %v1389_v35 }
 0x4b2   : > { %1084 = vperm.xlu1 %1336, %v1356_v43  }
 0x4b6   : > { %1337 = vset.pattern.permute.xlu1 %v1390_v42 }
 0x4b7   : > { %1095 = vperm.xlu1 %1337, %v1356_v43  }
 0x502   : > { %v649_v7 = vpop.permute.xlu1 %648 }
 0x503   : > { %v651_v47 = vadd.f32 %v649_v7, %v569_v46 }
 0x505   : > { %653 = vst.msk [vmem:[#allocation4] sm:$0xff] %vm652_vm8, %v651_v47 }
 0x50c   : > { %v762_v49 = vld [vmem:[#allocation4] sm:$0xff]  ;;  %v848_v34 = vpop.permute.xlu1 %847 }
 0x50d   : > { %v768_v50 = vmul.f32 %v766_v48, %v762_v49 }
 0x50f   : > { %v850_v51 = vadd.f32 %v848_v34, %v768_v50 }
 0x511   : > { %852 = vst.msk [vmem:[#allocation4] sm:$0xff] %vm851_vm9, %v850_v51 }
 0x518   : > { %v961_v35 = vld [vmem:[#allocation4] sm:$0xff] }
 0x519   : > { %v965_v52 = vpop.permute.xlu1 %964 }
 0x51a   : > { %v967_v42 = vmul.f32 %v965_v52, %v961_v35 }
 0x51d   : > { %v1047_v53 = vpop.permute.xlu1 %1046 }
 0x51e   : > { %v1049_v54 = vadd.f32 %v1047_v53, %v967_v42 }
 0x520   : > { %1051 = vst.msk [vmem:[#allocation4] sm:$0xff] %vm1050_vm10, %v1049_v54 }
 0x523   : > { %v1063_v56 = vpop.permute.xlu1 %1062 }
 0x527   : > { %v1059_v55 = vld [vmem:[#allocation4] sm:$0xff] }
 0x528   : > { %v1065_v57 = vmul.f32 %v1063_v56, %v1059_v55  ;;  %v1074_v59 = vpop.permute.xlu1 %1073 }
 0x52a   : > { %1066 = vst.msk [vmem:[#allocation4] sm:$0xff] %vm272_vm1, %v1065_v57 }
 0x52d   : > { %v1085_v62 = vpop.permute.xlu1 %1084 }
 0x531   : > { %v1070_v58 = vld [vmem:[#allocation4] sm:$0xff] }
 0x532   : > { %v1076_v60 = vmul.f32 %v1074_v59, %v1070_v58  ;;  %v1096_v2 = vpop.permute.xlu1 %1095 }
 0x534   : > { %1077 = vst.msk [vmem:[#allocation4] sm:$0xff] %vm652_vm8, %v1076_v60 }
 0x53b   : > { %v1081_v61 = vld [vmem:[#allocation4] sm:$0xff] }
 0x53c   : > { %v1087_v63 = vmul.f32 %v1085_v62, %v1081_v61 }
 0x53e   : > { %1088 = vst.msk [vmem:[#allocation4] sm:$0xff] %vm851_vm9, %v1087_v63 }
 0x545   : > { %v1092_v1 = vld [vmem:[#allocation4] sm:$0xff] }
 0x546   : > { %v1098_v3 = vmul.f32 %v1096_v2, %v1092_v1 }
 0x548   : > { %1099 = vst.msk [vmem:[#allocation4] sm:$0xff] %vm1050_vm10, %v1098_v3 }
 0x54f   : > { %v1100_v4 = vld [vmem:[#allocation4] sm:$0xff] }
 0x550   : > { %1102 = vst.msk [vmem:[%s259_s7] sm:$0xff] %vm267_vm5, %v1100_v4 }
 0x551 PF: > { %s13_s14 = sadd.s32 1, %s1379_s14   ;;  %s1594_s12 = smov %s1375_s13 }
 0x552   : > { %p10_p5 = scmp.ge.s32.totalorder %s13_s14, 4   ;;  %s1595_s13 = smov %s1597_s15 }
 0x554   :  { %12 = sbr.rel (!%p10_p5) target bundleno = 2 (0x2), region = 76 }

</bundles_post_ra>
